<compile_context>
chip_gen: v7x
topology: tpu7x:2x2x1
jax: 0.10.0
libtpu: 0.0.40
codegen_flags: <defaults>
</compile_context>

<pallas_src>
import functools
import numpy as np
import jax
import jax.numpy as jnp
from jax.experimental import pallas as pl
from jax.experimental.pallas import tpu as pltpu

_VMEM_LIMIT = 32 * 1024 * 1024   # < 64 MiB so the same kernels fit v7x per-core VMEM.


def _cp(dims):
    return pltpu.CompilerParams(dimension_semantics=dims,
                                vmem_limit_bytes=_VMEM_LIMIT)


def _tile(n, pref):
    t = min(n, pref)
    while t > 1 and n % t:
        t -= 1
    return max(t, 1)


def _lane_tile(m, cap=512):
    if m <= cap:
        return m
    for t in range(cap, 0, -128):
        if m % t == 0:
            return t
    return m


# --------------------------- 3x3 conv (tiled GEMM) ---------------------------

def _conv3x3_kernel(x_ref, w_ref, b_ref, o_ref, acc_ref, *, width, act):
    """One (row-tile, cout-tile, dy) grid step of a 3x3 'same' convolution.

    x_ref : (th, width+2, Cin) bf16  dy-shifted, width-padded activation rows
    w_ref : (3*Cin, tn)        bf16  weights of this dy tap, rows ordered (dx, ci)
    b_ref : (1, tn)            f32
    o_ref : (th, width, tn)    bf16
    acc_ref:(th, width, tn)    f32   accumulator across the dy grid axis
    """
    dy = pl.program_id(2)

    @pl.when(dy == 0)
    def _():
        acc_ref[...] = jnp.zeros_like(acc_ref)

    th = o_ref.shape[0]
    tn = o_ref.shape[-1]
    cin = x_ref.shape[-1]
    for rr in range(th):
        part = jnp.zeros((width, tn), jnp.float32)
        for dx in range(3):
            part += jnp.dot(x_ref[rr, dx:dx + width, :],
                            w_ref[dx * cin:(dx + 1) * cin, :],
                            preferred_element_type=jnp.float32)
        acc_ref[rr] += part

    @pl.when(dy == pl.num_programs(2) - 1)
    def _():
        out = acc_ref[...] + b_ref[0]
        if act == "relu":
            out = jnp.maximum(out, 0.0)
        o_ref[...] = out.astype(o_ref.dtype)


def conv3x3(x, w, b, act):
    """3x3 / stride 1 / pad 1 conv on NHWC via a tiled, pipelined MXU GEMM.

    The 9 taps are accumulated in-kernel (no 9x im2col slab in HBM): the three
    dy row shifts come in as cheap padded views streamed by BlockSpec, the
    three dx column shifts are static slices of the VMEM tile.
    """
    x = x.astype(jnp.bfloat16)
    B, H, W, C = x.shape
    Cout = w.shape[2]
    xp = jnp.pad(x, ((0, 0), (1, 1), (1, 1), (0, 0)))
    xs = jnp.stack([xp[:, dy:dy + H] for dy in range(3)], axis=0)
    xs = xs.reshape(3, B * H, W + 2, C)

    R = B * H
    th = _tile(R, 8)
    tn = min(Cout, 256)
    grid = (R // th, Cout // tn, 3)

    out = pl.pallas_call(
        functools.partial(_conv3x3_kernel, width=W, act=act),
        out_shape=jax.ShapeDtypeStruct((R, W, Cout), jnp.bfloat16),
        grid=grid,
        in_specs=[
            pl.BlockSpec((None, th, W + 2, C), lambda i, j, dy: (dy, i, 0, 0)),
            pl.BlockSpec((None, 3 * C, tn), lambda i, j, dy: (dy, 0, j)),
            pl.BlockSpec((1, tn), lambda i, j, dy: (0, j)),
        ],
        out_specs=pl.BlockSpec((th, W, tn), lambda i, j, dy: (i, 0, j)),
        scratch_shapes=[pltpu.VMEM((th, W, tn), jnp.float32)],
        compiler_params=_cp(("parallel", "parallel", "arbitrary")),
    )(xs, w, b)
    return out.reshape(B, H, W, Cout)


# ------------------------------- 2x2 max pool --------------------------------

def _maxpool_kernel(x_ref, o_ref, *, C):
    # x_ref: (tr, 2, W2, 2C) ; o_ref: (tr, W2, C)
    a = jnp.maximum(x_ref[:, 0, :, :], x_ref[:, 1, :, :])     # vertical max
    o_ref[...] = jnp.maximum(a[..., :C], a[..., C:])          # horizontal max


def maxpool2x2(x):
    """2x2 max pool, single kernel, single DMA (free reshape, no glue slices)."""
    B, H, W, C = x.shape
    H2, W2 = H // 2, W // 2
    xr = x.reshape(B * H2, 2, W2, 2 * C)
    R = B * H2
    tr = _tile(R, 8)
    out = pl.pallas_call(
        functools.partial(_maxpool_kernel, C=C),
        out_shape=jax.ShapeDtypeStruct((R, W2, C), x.dtype),
        grid=(R // tr,),
        in_specs=[pl.BlockSpec((tr, 2, W2, 2 * C), lambda i: (i, 0, 0, 0))],
        out_specs=pl.BlockSpec((tr, W2, C), lambda i: (i, 0, 0)),
        compiler_params=_cp(("parallel",)),
    )(xr)
    return out.reshape(B, H2, W2, C)


# -------------------- fused bilinear 2x upsample + skip add ------------------

def _interp_params(n, scale):
    """align_corners=True source indices/weights for size n -> n*scale."""
    m = n * scale
    if n == 1:
        return (np.zeros(m, np.int32), np.zeros(m, np.int32),
                np.zeros(m, np.float32))
    src = np.arange(m, dtype=np.float64) * (n - 1) / (m - 1)
    lo = np.minimum(np.floor(src), n - 2).astype(np.int32)
    fr = (src - lo).astype(np.float32)
    return lo, (lo + 1).astype(np.int32), fr


def _interp_matrix(n, scale):
    lo, hi, fr = _interp_params(n, scale)
    m = n * scale
    U = np.zeros((m, n), np.float32)
    U[np.arange(m), lo] += 1.0 - fr
    U[np.arange(m), hi] += fr
    return U


def _upsample_add_kernel(lo_ref, hi_ref, fy_ref, x_ref, uw_ref, skip_ref, o_ref):
    """Fused bilinear 2x upsample (align_corners=True) + skip-connection add.

    H axis: exact per-output-row VPU lerp (SMEM index/weight tables, dynamic
    leading-axis loads of x).  W axis: one small MXU matmul with the
    precomputed interpolation matrix.  Skip add fused before the single store.
    """
    ti = o_ref.shape[0]
    base = pl.program_id(0) * ti
    uw = uw_ref[...]
    for t in range(ti):
        i = base + t
        f = fy_ref[i]
        r0 = x_ref[lo_ref[i]].astype(jnp.float32)
        r1 = x_ref[hi_ref[i]].astype(jnp.float32)
        row = (r0 * (1.0 - f) + r1 * f).astype(jnp.bfloat16)        # (w, C)
        up = jnp.dot(uw, row, preferred_element_type=jnp.float32)    # (2w, C)
        o_ref[t] = (up + skip_ref[t].astype(jnp.float32)).astype(o_ref.dtype)


def upsample2x_add(x, skip):
    """nn.Upsample(scale_factor=2, 'bilinear', align_corners=True)(x) + skip."""
    B, h, w, C = x.shape
    lo, hi, fr = _interp_params(h, 2)
    boff = np.repeat(np.arange(B, dtype=np.int32), 2 * h) * h
    lo_g = jnp.asarray(boff + np.tile(lo, B), jnp.int32)
    hi_g = jnp.asarray(boff + np.tile(hi, B), jnp.int32)
    fr_g = jnp.asarray(np.tile(fr, B), jnp.float32)
    uw = jnp.asarray(_interp_matrix(w, 2), jnp.bfloat16)             # (2w, w)

    R = B * 2 * h
    ti = _tile(R, 8)
    x2 = x.astype(jnp.bfloat16).reshape(B * h, w, C)
    s2 = skip.astype(jnp.bfloat16).reshape(R, 2 * w, C)

    out = pl.pallas_call(
        _upsample_add_kernel,
        out_shape=jax.ShapeDtypeStruct((R, 2 * w, C), jnp.bfloat16),
        grid=(R // ti,),
        in_specs=[
            pl.BlockSpec(memory_space=pltpu.MemorySpace.SMEM),
            pl.BlockSpec(memory_space=pltpu.MemorySpace.SMEM),
            pl.BlockSpec(memory_space=pltpu.MemorySpace.SMEM),
            pl.BlockSpec((B * h, w, C), lambda i: (0, 0, 0)),
            pl.BlockSpec((2 * w, w), lambda i: (0, 0)),
            pl.BlockSpec((ti, 2 * w, C), lambda i: (i, 0, 0)),
        ],
        out_specs=pl.BlockSpec((ti, 2 * w, C), lambda i: (i, 0, 0)),
        compiler_params=_cp(("parallel",)),
    )(lo_g, hi_g, fr_g, x2, uw, s2)
    return out.reshape(B, 2 * h, 2 * w, C)


# ------------------------- MonoNet5 (filter network) -------------------------

def _xavier_conv3x3(key, cin, cout):
    fan_in, fan_out = cin * 9, cout * 9
    limit = float(np.sqrt(6.0 / (fan_in + fan_out)))
    # stored as (dy, dx*cin, cout) in bf16 for the in-kernel tap accumulation
    w = jax.random.uniform(key, (3, 3, cin, cout), jnp.float32, -limit, limit)
    w = w.reshape(3, 3 * cin, cout).astype(jnp.bfloat16)
    b = jnp.zeros((1, cout), jnp.float32)
    return w, b


def build_mononet5(key):
    keys = jax.random.split(key, 20)
    it = iter(keys)

    def conv(cin, cout, act="relu"):
        w, b = _xavier_conv3x3(next(it), cin, cout)
        return ("conv", w, b, act)

    trunk = [conv(6, 16)]
    for cin, cout in [(16, 32), (32, 64), (64, 128), (128, 256), (256, 512)]:
        trunk += [conv(cin, cout), ("maxpool",)]
    trunk += [conv(512, 512)]
    for cin, cout in [(512, 256), (256, 128), (128, 64), (64, 32), (32, 16)]:
        trunk += [("upsample",), conv(cin, cout)]
    branch1 = [conv(16, 16, "relu"), conv(16, 16, "none")]
    branch2 = [conv(16, 16, "relu"), conv(16, 16, "none")]
    return trunk, branch1, branch2


def forward_single_path(layers, x):
    # Mirrors DAIN.forward_singlePath: push before every MaxPool; the
    # pop-and-add after every bilinear Upsample is fused into the upsample.
    stack = []
    temp = x
    for kind, *rest in layers:
        if kind == "conv":
            w, b, act = rest
            temp = conv3x3(temp, w, b, act)
        elif kind == "maxpool":
            stack.append(temp)
            temp = maxpool2x2(temp)
        elif kind == "upsample":
            temp = upsample2x_add(temp, stack.pop())
        else:
            raise ValueError(kind)
    return temp


# ------------------------ filter interpolation path --------------------------

def _bilinear_sample_chw(img, py, px):
    """Bilinear sample an NCHW image at float coords (border-clamped). Glue."""
    B, C, H, W = img.shape
    y0 = jnp.floor(py)
    x0 = jnp.floor(px)
    wy = (py - y0)[:, None, :, :]
    wx = (px - x0)[:, None, :, :]
    y0i = jnp.clip(y0.astype(jnp.int32), 0, H - 1)
    x0i = jnp.clip(x0.astype(jnp.int32), 0, W - 1)
    y1i = jnp.clip(y0i + 1, 0, H - 1)
    x1i = jnp.clip(x0i + 1, 0, W - 1)
    gather = jax.vmap(lambda im, yy, xx: im[:, yy, xx])
    v00 = gather(img, y0i, x0i)
    v01 = gather(img, y0i, x1i)
    v10 = gather(img, y1i, x0i)
    v11 = gather(img, y1i, x1i)
    return (v00 * (1 - wy) * (1 - wx) + v01 * (1 - wy) * wx
            + v10 * wy * (1 - wx) + v11 * wy * wx)


def _gather_taps(img, offset):
    """16 bilinear samples of a 4x4 window at flow-displaced positions.

    img: (B, C, H, W) f32; offset: (B, 2, H, W) (x, y); returns (16, C, B*H*W).
    """
    B, C, H, W = img.shape
    ys = jnp.arange(H, dtype=jnp.float32)[None, :, None]
    xs = jnp.arange(W, dtype=jnp.float32)[None, None, :]
    py = ys + offset[:, 1]
    px = xs + offset[:, 0]
    taps = []
    for fj in range(4):
        for fi in range(4):
            taps.append(_bilinear_sample_chw(img, py + (fj - 1.0), px + (fi - 1.0)))
    t = jnp.stack(taps, axis=0)                 # (16, B, C, H, W)
    t = jnp.transpose(t, (0, 2, 1, 3, 4))       # free when B == 1
    return t.reshape(16, C, B * H * W)


def _filter_blend_kernel(s0_ref, f0_ref, s1_ref, f1_ref, o_ref, *, t):
    # s*: (16, C, tm) f32 taps; f*: (16, tm) bf16 adaptive filter weights
    acc = jnp.zeros(o_ref.shape, jnp.float32)
    for k in range(16):                          # 4x4 adaptive filter taps
        acc += ((1.0 - t) * s0_ref[k] * f0_ref[k].astype(jnp.float32)
                + t * s1_ref[k] * f1_ref[k].astype(jnp.float32))
    o_ref[...] = acc


def FilterInterpolate(ref0, ref2, offset, filt, time_offset):
    # TODO(synk): exact boundary/tap semantics of the CUDA
    # FilterInterpolationModule are not in the given source; implemented as a
    # 4x4 adaptive filter over bilinearly sampled taps at flow-displaced
    # positions (gather in XLA glue, weighted reduction + time blend in Pallas).
    # The per-frame ref0/ref2 warp outputs are dropped (unused when rectify=False).
    B, C, H, W = ref0.shape
    M = B * H * W
    s0 = _gather_taps(ref0, offset[0])           # (16, C, M) f32
    s1 = _gather_taps(ref2, offset[1])
    f0 = filt[0].reshape(M, 16).T                # (16, M)
    f1 = filt[1].reshape(M, 16).T
    tm = _lane_tile(M)

    out = pl.pallas_call(
        functools.partial(_filter_blend_kernel, t=float(time_offset)),
        out_shape=jax.ShapeDtypeStruct((C, M), jnp.float32),
        grid=(M // tm,),
        in_specs=[
            pl.BlockSpec((16, C, tm), lambda i: (0, 0, i)),
            pl.BlockSpec((16, tm), lambda i: (0, i)),
            pl.BlockSpec((16, C, tm), lambda i: (0, 0, i)),
            pl.BlockSpec((16, tm), lambda i: (0, i)),
        ],
        out_specs=pl.BlockSpec((C, tm), lambda i: (0, i)),
        compiler_params=_cp(("parallel",)),
    )(s0, f0, s1, f1)
    return out.reshape(C, B, H, W).transpose(1, 0, 2, 3)


# --------------------------------- the module --------------------------------

class DAINSlowmotionPallas:
    def __init__(self, size, batch_size=1, sf=2, rectify=False, padding=None,
                 useAnimationMethod=1, key=None):
        # TODO(synk): S2DF ctxNet / MultipleBasicBlock rectifyNet are not defined
        # in the given source; only the rectify=False path is implemented.
        assert not rectify
        # TODO(synk): HourGlass depthNet is not defined in the given source; only
        # the useAnimationMethod=1 (depth-free) path is implemented.
        assert useAnimationMethod == 1
        self.size = size
        self.batch_size = batch_size
        self.padding = padding
        self.useAnimationMethod = useAnimationMethod
        self.time_offsets = [kk / sf for kk in range(1, sf)]
        if key is None:
            key = jax.random.PRNGKey(0)
        self.trunk, self.branch1, self.branch2 = build_mononet5(key)
        # TODO(synk): PWCDCNet (flownets) weights/architecture are not defined in
        # the given source; the quarter-resolution flow is stubbed as zeros, so
        # 20*t*flow and its x4 bilinear upsample fold to zero constants.

    def FlowProject(self, inputs, depth=None):
        # TODO(synk): DepthFlowProjectionModule is an external CUDA op
        # (depth-weighted flow splatting) not defined in the given source;
        # identity pass-through.
        del depth
        return [x for x in inputs]

    def forward(self, I0, I1, target, count):
        p = self.padding
        B, _, H, W = I0.shape

        target = target.at[count].set(I0[0, :, p[2]:p[3], p[0]:p[1]])
        count += 1

        cat1 = jnp.concatenate((I0, I1), axis=1)               # NCHW (B, 6, H, W)

        # Depth path (useAnimationMethod == 1): log_depth = d*0 and
        # depth_inv = d*0 + 1e-6 + 10000 are compile-time constants -> folded.
        # TODO(synk): the original slices temp[:batch_size]/temp[batch_size:],
        # which only partitions correctly when depthNet(cat0) (batch 2B) is
        # used; both entries keep the full batch here.
        depth_inv = [jnp.full((B, 1, H, W), 1e-6 + 10000.0, jnp.float32)] * 2

        # MonoNet5 filter network (Pallas conv / pool / fused-upsample hot path)
        x = jnp.transpose(cat1, (0, 2, 3, 1)).astype(jnp.bfloat16)   # NCHW -> NHWC
        temp = forward_single_path(self.trunk, x)
        cur_filter_output = [forward_single_path(self.branch1, temp),
                             forward_single_path(self.branch2, temp)]  # (B,H,W,16)

        # Flow path: flownets stub outputs zero flow, so the scaled (20*t) and
        # x4-bilinear-upsampled offsets fold to zero constants (no kernels).
        zero_flow = jnp.zeros((B, 2, H, W), jnp.float32)
        cur_offset_outputs = [
            [zero_flow for _ in self.time_offsets],
            [zero_flow for _ in self.time_offsets],
        ]
        cur_offset_outputs = [
            self.FlowProject(cur_offset_outputs[0], depth_inv[0]),
            self.FlowProject(cur_offset_outputs[1], depth_inv[1]),
        ]

        for temp_0, temp_1, timeoffset in zip(cur_offset_outputs[0],
                                              cur_offset_outputs[1],
                                              self.time_offsets):
            cur_offset_output = [temp_0, temp_1]
            cur_out = FilterInterpolate(I0, I1, cur_offset_output,
                                        cur_filter_output, timeoffset)
            cur_out = cur_out[:, :, p[2]:p[3], p[0]:p[1]]
            target = target.at[count].set(cur_out[0])
            count += 1
        return target, count


# ----------------------------------- demo ------------------------------------

if __name__ == "__main__":
    key = jax.random.PRNGKey(0)
    kp, k0, k1 = jax.random.split(key, 3)

    B, H, W = 1, 32, 32                       # H, W divisible by 32 (5 pooling stages)
    I0 = jax.random.uniform(k0, (B, 3, H, W), jnp.float32)
    I1 = jax.random.uniform(k1, (B, 3, H, W), jnp.float32)
    padding = (0, W, 0, H)                    # (x0, x1, y0, y1) crop = full frame

    model = DAINSlowmotionPallas(size=(H, W), batch_size=B, sf=2, rectify=False,
                                 padding=padding, useAnimationMethod=1, key=kp)

    target = jnp.zeros((3, 3, H, W), jnp.float32)
    count = 0
    target, count = model.forward(I0, I1, target, count)

    jax.block_until_ready(target)
    assert count == 2
    assert bool(jnp.all(jnp.isfinite(target)))
    print("KERNEL_OK")
</pallas_src>

<mosaic_0001>
module attributes {stable_mosaic.version = 11 : i64} {
  func.func @_conv3x3_kernel(%arg0: i32, %arg1: i32, %arg2: i32, %arg3: memref<1x8x34x6xbf16, #tpu.memory_space<vmem>>, %arg4: memref<1x18x16xbf16, #tpu.memory_space<vmem>>, %arg5: memref<1x16xf32, #tpu.memory_space<vmem>>, %arg6: memref<8x32x16xbf16, #tpu.memory_space<vmem>>, %arg7: memref<8x32x16xf32, #tpu.memory_space<vmem>>) attributes {dimension_semantics = [#tpu.dimension_semantics<parallel>, #tpu.dimension_semantics<parallel>, #tpu.dimension_semantics<arbitrary>], iteration_bounds = array<i64: 4, 1, 3>, scalar_prefetch = 0 : i64, scratch_operands = 1 : i64, tpu.core_type = #tpu.core_type<tc>, window_params = [{transform_indices = @transform_0, window_bounds = array<i64: 1, 8, 34, 6>}, {transform_indices = @transform_1, window_bounds = array<i64: 1, 18, 16>}, {transform_indices = @transform_2, window_bounds = array<i64: 1, 16>}, {transform_indices = @transform_3, window_bounds = array<i64: 8, 32, 16>}]} {
    %c0_i32 = arith.constant 0 : i32
    %0 = arith.cmpi eq, %arg2, %c0_i32 : i32
    %1 = arith.extui %0 : i1 to i32
    %c0_i32_0 = arith.constant 0 : i32
    %2 = arith.cmpi ne, %1, %c0_i32_0 : i32
    scf.if %2 {
      %cst_240 = arith.constant 0.000000e+00 : f32
      %206 = vector.broadcast %cst_240 : f32 to vector<8x32x16xf32>
      %c0_241 = arith.constant 0 : index
      %c0_242 = arith.constant 0 : index
      %c0_243 = arith.constant 0 : index
      %207 = vector.load %arg7[%c0_241, %c0_242, %c0_243] : memref<8x32x16xf32, #tpu.memory_space<vmem>>, vector<8x32x16xf32>
      tpu.vector_store %arg7[%c0_241, %c0_242, %c0_243], %206 {strides = array<i32>} : memref<8x32x16xf32, #tpu.memory_space<vmem>>, vector<8x32x16xf32>,
    } else {
    }
    %cst = arith.constant 0.000000e+00 : f32
    %3 = vector.broadcast %cst : f32 to vector<32x16xf32>
    %c0 = arith.constant 0 : index
    %c0_1 = arith.constant 0 : index
    %c0_2 = arith.constant 0 : index
    %c0_3 = arith.constant 0 : index
    %4 = vector.load %arg3[%c0, %c0_1, %c0_2, %c0_3] : memref<1x8x34x6xbf16, #tpu.memory_space<vmem>>, vector<1x1x32x6xbf16>
    %5 = vector.shape_cast %4 : vector<1x1x32x6xbf16> to vector<32x6xbf16>
    %c0_4 = arith.constant 0 : index
    %c0_5 = arith.constant 0 : index
    %c0_6 = arith.constant 0 : index
    %6 = vector.load %arg4[%c0_4, %c0_5, %c0_6] : memref<1x18x16xbf16, #tpu.memory_space<vmem>>, vector<1x6x16xbf16>
    %7 = vector.shape_cast %6 : vector<1x6x16xbf16> to vector<6x16xbf16>
    %cst_7 = arith.constant dense<0.000000e+00> : vector<32x16xf32>
    %8 = tpu.matmul %5, %7, %cst_7 {dimension_numbers = #tpu.dot_dimension_numbers<[1], [0], [0], [1], [0, 0, 1, 1], [], []>} : vector<32x6xbf16>, vector<6x16xbf16>, vector<32x16xf32> -> vector<32x16xf32>
    %9 = arith.addf %3, %8 : vector<32x16xf32>
    %c0_8 = arith.constant 0 : index
    %c0_9 = arith.constant 0 : index
    %c1 = arith.constant 1 : index
    %c0_10 = arith.constant 0 : index
    %10 = vector.load %arg3[%c0_8, %c0_9, %c1, %c0_10] : memref<1x8x34x6xbf16, #tpu.memory_space<vmem>>, vector<1x1x32x6xbf16>
    %11 = vector.shape_cast %10 : vector<1x1x32x6xbf16> to vector<32x6xbf16>
    %c0_11 = arith.constant 0 : index
    %c6 = arith.constant 6 : index
    %c0_12 = arith.constant 0 : index
    %12 = vector.load %arg4[%c0_11, %c6, %c0_12] : memref<1x18x16xbf16, #tpu.memory_space<vmem>>, vector<1x6x16xbf16>
    %13 = vector.shape_cast %12 : vector<1x6x16xbf16> to vector<6x16xbf16>
    %cst_13 = arith.constant dense<0.000000e+00> : vector<32x16xf32>
    %14 = tpu.matmul %11, %13, %cst_13 {dimension_numbers = #tpu.dot_dimension_numbers<[1], [0], [0], [1], [0, 0, 1, 1], [], []>} : vector<32x6xbf16>, vector<6x16xbf16>, vector<32x16xf32> -> vector<32x16xf32>
    %15 = arith.addf %9, %14 : vector<32x16xf32>
    %c0_14 = arith.constant 0 : index
    %c0_15 = arith.constant 0 : index
    %c2 = arith.constant 2 : index
    %c0_16 = arith.constant 0 : index
    %16 = vector.load %arg3[%c0_14, %c0_15, %c2, %c0_16] : memref<1x8x34x6xbf16, #tpu.memory_space<vmem>>, vector<1x1x32x6xbf16>
    %17 = vector.shape_cast %16 : vector<1x1x32x6xbf16> to vector<32x6xbf16>
    %c0_17 = arith.constant 0 : index
    %c12 = arith.constant 12 : index
    %c0_18 = arith.constant 0 : index
    %18 = vector.load %arg4[%c0_17, %c12, %c0_18] : memref<1x18x16xbf16, #tpu.memory_space<vmem>>, vector<1x6x16xbf16>
    %19 = vector.shape_cast %18 : vector<1x6x16xbf16> to vector<6x16xbf16>
    %cst_19 = arith.constant dense<0.000000e+00> : vector<32x16xf32>
    %20 = tpu.matmul %17, %19, %cst_19 {dimension_numbers = #tpu.dot_dimension_numbers<[1], [0], [0], [1], [0, 0, 1, 1], [], []>} : vector<32x6xbf16>, vector<6x16xbf16>, vector<32x16xf32> -> vector<32x16xf32>
    %21 = arith.addf %15, %20 : vector<32x16xf32>
    %c0_20 = arith.constant 0 : index
    %c0_21 = arith.constant 0 : index
    %c0_22 = arith.constant 0 : index
    %22 = vector.load %arg7[%c0_20, %c0_21, %c0_22] : memref<8x32x16xf32, #tpu.memory_space<vmem>>, vector<1x32x16xf32>
    %23 = vector.shape_cast %22 : vector<1x32x16xf32> to vector<32x16xf32>
    %24 = arith.addf %23, %21 : vector<32x16xf32>
    %c0_23 = arith.constant 0 : index
    %c0_24 = arith.constant 0 : index
    %c0_25 = arith.constant 0 : index
    %25 = vector.load %arg7[%c0_23, %c0_24, %c0_25] : memref<8x32x16xf32, #tpu.memory_space<vmem>>, vector<1x32x16xf32>
    %26 = vector.shape_cast %25 : vector<1x32x16xf32> to vector<32x16xf32>
    %27 = vector.shape_cast %24 : vector<32x16xf32> to vector<1x32x16xf32>
    tpu.vector_store %arg7[%c0_23, %c0_24, %c0_25], %27 {strides = array<i32>} : memref<8x32x16xf32, #tpu.memory_space<vmem>>, vector<1x32x16xf32>,
    %cst_26 = arith.constant 0.000000e+00 : f32
    %28 = vector.broadcast %cst_26 : f32 to vector<32x16xf32>
    %c0_27 = arith.constant 0 : index
    %c1_28 = arith.constant 1 : index
    %c0_29 = arith.constant 0 : index
    %c0_30 = arith.constant 0 : index
    %29 = vector.load %arg3[%c0_27, %c1_28, %c0_29, %c0_30] : memref<1x8x34x6xbf16, #tpu.memory_space<vmem>>, vector<1x1x32x6xbf16>
    %30 = vector.shape_cast %29 : vector<1x1x32x6xbf16> to vector<32x6xbf16>
    %c0_31 = arith.constant 0 : index
    %c0_32 = arith.constant 0 : index
    %c0_33 = arith.constant 0 : index
    %31 = vector.load %arg4[%c0_31, %c0_32, %c0_33] : memref<1x18x16xbf16, #tpu.memory_space<vmem>>, vector<1x6x16xbf16>
    %32 = vector.shape_cast %31 : vector<1x6x16xbf16> to vector<6x16xbf16>
    %cst_34 = arith.constant dense<0.000000e+00> : vector<32x16xf32>
    %33 = tpu.matmul %30, %32, %cst_34 {dimension_numbers = #tpu.dot_dimension_numbers<[1], [0], [0], [1], [0, 0, 1, 1], [], []>} : vector<32x6xbf16>, vector<6x16xbf16>, vector<32x16xf32> -> vector<32x16xf32>
    %34 = arith.addf %28, %33 : vector<32x16xf32>
    %c0_35 = arith.constant 0 : index
    %c1_36 = arith.constant 1 : index
    %c1_37 = arith.constant 1 : index
    %c0_38 = arith.constant 0 : index
    %35 = vector.load %arg3[%c0_35, %c1_36, %c1_37, %c0_38] : memref<1x8x34x6xbf16, #tpu.memory_space<vmem>>, vector<1x1x32x6xbf16>
    %36 = vector.shape_cast %35 : vector<1x1x32x6xbf16> to vector<32x6xbf16>
    %c0_39 = arith.constant 0 : index
    %c6_40 = arith.constant 6 : index
    %c0_41 = arith.constant 0 : index
    %37 = vector.load %arg4[%c0_39, %c6_40, %c0_41] : memref<1x18x16xbf16, #tpu.memory_space<vmem>>, vector<1x6x16xbf16>
    %38 = vector.shape_cast %37 : vector<1x6x16xbf16> to vector<6x16xbf16>
    %cst_42 = arith.constant dense<0.000000e+00> : vector<32x16xf32>
    %39 = tpu.matmul %36, %38, %cst_42 {dimension_numbers = #tpu.dot_dimension_numbers<[1], [0], [0], [1], [0, 0, 1, 1], [], []>} : vector<32x6xbf16>, vector<6x16xbf16>, vector<32x16xf32> -> vector<32x16xf32>
    %40 = arith.addf %34, %39 : vector<32x16xf32>
    %c0_43 = arith.constant 0 : index
    %c1_44 = arith.constant 1 : index
    %c2_45 = arith.constant 2 : index
    %c0_46 = arith.constant 0 : index
    %41 = vector.load %arg3[%c0_43, %c1_44, %c2_45, %c0_46] : memref<1x8x34x6xbf16, #tpu.memory_space<vmem>>, vector<1x1x32x6xbf16>
    %42 = vector.shape_cast %41 : vector<1x1x32x6xbf16> to vector<32x6xbf16>
    %c0_47 = arith.constant 0 : index
    %c12_48 = arith.constant 12 : index
    %c0_49 = arith.constant 0 : index
    %43 = vector.load %arg4[%c0_47, %c12_48, %c0_49] : memref<1x18x16xbf16, #tpu.memory_space<vmem>>, vector<1x6x16xbf16>
    %44 = vector.shape_cast %43 : vector<1x6x16xbf16> to vector<6x16xbf16>
    %cst_50 = arith.constant dense<0.000000e+00> : vector<32x16xf32>
    %45 = tpu.matmul %42, %44, %cst_50 {dimension_numbers = #tpu.dot_dimension_numbers<[1], [0], [0], [1], [0, 0, 1, 1], [], []>} : vector<32x6xbf16>, vector<6x16xbf16>, vector<32x16xf32> -> vector<32x16xf32>
    %46 = arith.addf %40, %45 : vector<32x16xf32>
    %c1_51 = arith.constant 1 : index
    %c0_52 = arith.constant 0 : index
    %c0_53 = arith.constant 0 : index
    %47 = vector.load %arg7[%c1_51, %c0_52, %c0_53] : memref<8x32x16xf32, #tpu.memory_space<vmem>>, vector<1x32x16xf32>
    %48 = vector.shape_cast %47 : vector<1x32x16xf32> to vector<32x16xf32>
    %49 = arith.addf %48, %46 : vector<32x16xf32>
    %c1_54 = arith.constant 1 : index
    %c0_55 = arith.constant 0 : index
    %c0_56 = arith.constant 0 : index
    %50 = vector.load %arg7[%c1_54, %c0_55, %c0_56] : memref<8x32x16xf32, #tpu.memory_space<vmem>>, vector<1x32x16xf32>
    %51 = vector.shape_cast %50 : vector<1x32x16xf32> to vector<32x16xf32>
    %52 = vector.shape_cast %49 : vector<32x16xf32> to vector<1x32x16xf32>
    tpu.vector_store %arg7[%c1_54, %c0_55, %c0_56], %52 {strides = array<i32>} : memref<8x32x16xf32, #tpu.memory_space<vmem>>, vector<1x32x16xf32>,
    %cst_57 = arith.constant 0.000000e+00 : f32
    %53 = vector.broadcast %cst_57 : f32 to vector<32x16xf32>
    %c0_58 = arith.constant 0 : index
    %c2_59 = arith.constant 2 : index
    %c0_60 = arith.constant 0 : index
    %c0_61 = arith.constant 0 : index
    %54 = vector.load %arg3[%c0_58, %c2_59, %c0_60, %c0_61] : memref<1x8x34x6xbf16, #tpu.memory_space<vmem>>, vector<1x1x32x6xbf16>
    %55 = vector.shape_cast %54 : vector<1x1x32x6xbf16> to vector<32x6xbf16>
    %c0_62 = arith.constant 0 : index
    %c0_63 = arith.constant 0 : index
    %c0_64 = arith.constant 0 : index
    %56 = vector.load %arg4[%c0_62, %c0_63, %c0_64] : memref<1x18x16xbf16, #tpu.memory_space<vmem>>, vector<1x6x16xbf16>
    %57 = vector.shape_cast %56 : vector<1x6x16xbf16> to vector<6x16xbf16>
    %cst_65 = arith.constant dense<0.000000e+00> : vector<32x16xf32>
    %58 = tpu.matmul %55, %57, %cst_65 {dimension_numbers = #tpu.dot_dimension_numbers<[1], [0], [0], [1], [0, 0, 1, 1], [], []>} : vector<32x6xbf16>, vector<6x16xbf16>, vector<32x16xf32> -> vector<32x16xf32>
    %59 = arith.addf %53, %58 : vector<32x16xf32>
    %c0_66 = arith.constant 0 : index
    %c2_67 = arith.constant 2 : index
    %c1_68 = arith.constant 1 : index
    %c0_69 = arith.constant 0 : index
    %60 = vector.load %arg3[%c0_66, %c2_67, %c1_68, %c0_69] : memref<1x8x34x6xbf16, #tpu.memory_space<vmem>>, vector<1x1x32x6xbf16>
    %61 = vector.shape_cast %60 : vector<1x1x32x6xbf16> to vector<32x6xbf16>
    %c0_70 = arith.constant 0 : index
    %c6_71 = arith.constant 6 : index
    %c0_72 = arith.constant 0 : index
    %62 = vector.load %arg4[%c0_70, %c6_71, %c0_72] : memref<1x18x16xbf16, #tpu.memory_space<vmem>>, vector<1x6x16xbf16>
    %63 = vector.shape_cast %62 : vector<1x6x16xbf16> to vector<6x16xbf16>
    %cst_73 = arith.constant dense<0.000000e+00> : vector<32x16xf32>
    %64 = tpu.matmul %61, %63, %cst_73 {dimension_numbers = #tpu.dot_dimension_numbers<[1], [0], [0], [1], [0, 0, 1, 1], [], []>} : vector<32x6xbf16>, vector<6x16xbf16>, vector<32x16xf32> -> vector<32x16xf32>
    %65 = arith.addf %59, %64 : vector<32x16xf32>
    %c0_74 = arith.constant 0 : index
    %c2_75 = arith.constant 2 : index
    %c2_76 = arith.constant 2 : index
    %c0_77 = arith.constant 0 : index
    %66 = vector.load %arg3[%c0_74, %c2_75, %c2_76, %c0_77] : memref<1x8x34x6xbf16, #tpu.memory_space<vmem>>, vector<1x1x32x6xbf16>
    %67 = vector.shape_cast %66 : vector<1x1x32x6xbf16> to vector<32x6xbf16>
    %c0_78 = arith.constant 0 : index
    %c12_79 = arith.constant 12 : index
    %c0_80 = arith.constant 0 : index
    %68 = vector.load %arg4[%c0_78, %c12_79, %c0_80] : memref<1x18x16xbf16, #tpu.memory_space<vmem>>, vector<1x6x16xbf16>
    %69 = vector.shape_cast %68 : vector<1x6x16xbf16> to vector<6x16xbf16>
    %cst_81 = arith.constant dense<0.000000e+00> : vector<32x16xf32>
    %70 = tpu.matmul %67, %69, %cst_81 {dimension_numbers = #tpu.dot_dimension_numbers<[1], [0], [0], [1], [0, 0, 1, 1], [], []>} : vector<32x6xbf16>, vector<6x16xbf16>, vector<32x16xf32> -> vector<32x16xf32>
    %71 = arith.addf %65, %70 : vector<32x16xf32>
    %c2_82 = arith.constant 2 : index
    %c0_83 = arith.constant 0 : index
    %c0_84 = arith.constant 0 : index
    %72 = vector.load %arg7[%c2_82, %c0_83, %c0_84] : memref<8x32x16xf32, #tpu.memory_space<vmem>>, vector<1x32x16xf32>
    %73 = vector.shape_cast %72 : vector<1x32x16xf32> to vector<32x16xf32>
    %74 = arith.addf %73, %71 : vector<32x16xf32>
    %c2_85 = arith.constant 2 : index
    %c0_86 = arith.constant 0 : index
    %c0_87 = arith.constant 0 : index
    %75 = vector.load %arg7[%c2_85, %c0_86, %c0_87] : memref<8x32x16xf32, #tpu.memory_space<vmem>>, vector<1x32x16xf32>
    %76 = vector.shape_cast %75 : vector<1x32x16xf32> to vector<32x16xf32>
    %77 = vector.shape_cast %74 : vector<32x16xf32> to vector<1x32x16xf32>
    tpu.vector_store %arg7[%c2_85, %c0_86, %c0_87], %77 {strides = array<i32>} : memref<8x32x16xf32, #tpu.memory_space<vmem>>, vector<1x32x16xf32>,
    %cst_88 = arith.constant 0.000000e+00 : f32
    %78 = vector.broadcast %cst_88 : f32 to vector<32x16xf32>
    %c0_89 = arith.constant 0 : index
    %c3 = arith.constant 3 : index
    %c0_90 = arith.constant 0 : index
    %c0_91 = arith.constant 0 : index
    %79 = vector.load %arg3[%c0_89, %c3, %c0_90, %c0_91] : memref<1x8x34x6xbf16, #tpu.memory_space<vmem>>, vector<1x1x32x6xbf16>
    %80 = vector.shape_cast %79 : vector<1x1x32x6xbf16> to vector<32x6xbf16>
    %c0_92 = arith.constant 0 : index
    %c0_93 = arith.constant 0 : index
    %c0_94 = arith.constant 0 : index
    %81 = vector.load %arg4[%c0_92, %c0_93, %c0_94] : memref<1x18x16xbf16, #tpu.memory_space<vmem>>, vector<1x6x16xbf16>
    %82 = vector.shape_cast %81 : vector<1x6x16xbf16> to vector<6x16xbf16>
    %cst_95 = arith.constant dense<0.000000e+00> : vector<32x16xf32>
    %83 = tpu.matmul %80, %82, %cst_95 {dimension_numbers = #tpu.dot_dimension_numbers<[1], [0], [0], [1], [0, 0, 1, 1], [], []>} : vector<32x6xbf16>, vector<6x16xbf16>, vector<32x16xf32> -> vector<32x16xf32>
    %84 = arith.addf %78, %83 : vector<32x16xf32>
    %c0_96 = arith.constant 0 : index
    %c3_97 = arith.constant 3 : index
    %c1_98 = arith.constant 1 : index
    %c0_99 = arith.constant 0 : index
    %85 = vector.load %arg3[%c0_96, %c3_97, %c1_98, %c0_99] : memref<1x8x34x6xbf16, #tpu.memory_space<vmem>>, vector<1x1x32x6xbf16>
    %86 = vector.shape_cast %85 : vector<1x1x32x6xbf16> to vector<32x6xbf16>
    %c0_100 = arith.constant 0 : index
    %c6_101 = arith.constant 6 : index
    %c0_102 = arith.constant 0 : index
    %87 = vector.load %arg4[%c0_100, %c6_101, %c0_102] : memref<1x18x16xbf16, #tpu.memory_space<vmem>>, vector<1x6x16xbf16>
    %88 = vector.shape_cast %87 : vector<1x6x16xbf16> to vector<6x16xbf16>
    %cst_103 = arith.constant dense<0.000000e+00> : vector<32x16xf32>
    %89 = tpu.matmul %86, %88, %cst_103 {dimension_numbers = #tpu.dot_dimension_numbers<[1], [0], [0], [1], [0, 0, 1, 1], [], []>} : vector<32x6xbf16>, vector<6x16xbf16>, vector<32x16xf32> -> vector<32x16xf32>
    %90 = arith.addf %84, %89 : vector<32x16xf32>
    %c0_104 = arith.constant 0 : index
    %c3_105 = arith.constant 3 : index
    %c2_106 = arith.constant 2 : index
    %c0_107 = arith.constant 0 : index
    %91 = vector.load %arg3[%c0_104, %c3_105, %c2_106, %c0_107] : memref<1x8x34x6xbf16, #tpu.memory_space<vmem>>, vector<1x1x32x6xbf16>
    %92 = vector.shape_cast %91 : vector<1x1x32x6xbf16> to vector<32x6xbf16>
    %c0_108 = arith.constant 0 : index
    %c12_109 = arith.constant 12 : index
    %c0_110 = arith.constant 0 : index
    %93 = vector.load %arg4[%c0_108, %c12_109, %c0_110] : memref<1x18x16xbf16, #tpu.memory_space<vmem>>, vector<1x6x16xbf16>
    %94 = vector.shape_cast %93 : vector<1x6x16xbf16> to vector<6x16xbf16>
    %cst_111 = arith.constant dense<0.000000e+00> : vector<32x16xf32>
    %95 = tpu.matmul %92, %94, %cst_111 {dimension_numbers = #tpu.dot_dimension_numbers<[1], [0], [0], [1], [0, 0, 1, 1], [], []>} : vector<32x6xbf16>, vector<6x16xbf16>, vector<32x16xf32> -> vector<32x16xf32>
    %96 = arith.addf %90, %95 : vector<32x16xf32>
    %c3_112 = arith.constant 3 : index
    %c0_113 = arith.constant 0 : index
    %c0_114 = arith.constant 0 : index
    %97 = vector.load %arg7[%c3_112, %c0_113, %c0_114] : memref<8x32x16xf32, #tpu.memory_space<vmem>>, vector<1x32x16xf32>
    %98 = vector.shape_cast %97 : vector<1x32x16xf32> to vector<32x16xf32>
    %99 = arith.addf %98, %96 : vector<32x16xf32>
    %c3_115 = arith.constant 3 : index
    %c0_116 = arith.constant 0 : index
    %c0_117 = arith.constant 0 : index
    %100 = vector.load %arg7[%c3_115, %c0_116, %c0_117] : memref<8x32x16xf32, #tpu.memory_space<vmem>>, vector<1x32x16xf32>
    %101 = vector.shape_cast %100 : vector<1x32x16xf32> to vector<32x16xf32>
    %102 = vector.shape_cast %99 : vector<32x16xf32> to vector<1x32x16xf32>
    tpu.vector_store %arg7[%c3_115, %c0_116, %c0_117], %102 {strides = array<i32>} : memref<8x32x16xf32, #tpu.memory_space<vmem>>, vector<1x32x16xf32>,
    %cst_118 = arith.constant 0.000000e+00 : f32
    %103 = vector.broadcast %cst_118 : f32 to vector<32x16xf32>
    %c0_119 = arith.constant 0 : index
    %c4 = arith.constant 4 : index
    %c0_120 = arith.constant 0 : index
    %c0_121 = arith.constant 0 : index
    %104 = vector.load %arg3[%c0_119, %c4, %c0_120, %c0_121] : memref<1x8x34x6xbf16, #tpu.memory_space<vmem>>, vector<1x1x32x6xbf16>
    %105 = vector.shape_cast %104 : vector<1x1x32x6xbf16> to vector<32x6xbf16>
    %c0_122 = arith.constant 0 : index
    %c0_123 = arith.constant 0 : index
    %c0_124 = arith.constant 0 : index
    %106 = vector.load %arg4[%c0_122, %c0_123, %c0_124] : memref<1x18x16xbf16, #tpu.memory_space<vmem>>, vector<1x6x16xbf16>
    %107 = vector.shape_cast %106 : vector<1x6x16xbf16> to vector<6x16xbf16>
    %cst_125 = arith.constant dense<0.000000e+00> : vector<32x16xf32>
    %108 = tpu.matmul %105, %107, %cst_125 {dimension_numbers = #tpu.dot_dimension_numbers<[1], [0], [0], [1], [0, 0, 1, 1], [], []>} : vector<32x6xbf16>, vector<6x16xbf16>, vector<32x16xf32> -> vector<32x16xf32>
    %109 = arith.addf %103, %108 : vector<32x16xf32>
    %c0_126 = arith.constant 0 : index
    %c4_127 = arith.constant 4 : index
    %c1_128 = arith.constant 1 : index
    %c0_129 = arith.constant 0 : index
    %110 = vector.load %arg3[%c0_126, %c4_127, %c1_128, %c0_129] : memref<1x8x34x6xbf16, #tpu.memory_space<vmem>>, vector<1x1x32x6xbf16>
    %111 = vector.shape_cast %110 : vector<1x1x32x6xbf16> to vector<32x6xbf16>
    %c0_130 = arith.constant 0 : index
    %c6_131 = arith.constant 6 : index
    %c0_132 = arith.constant 0 : index
    %112 = vector.load %arg4[%c0_130, %c6_131, %c0_132] : memref<1x18x16xbf16, #tpu.memory_space<vmem>>, vector<1x6x16xbf16>
    %113 = vector.shape_cast %112 : vector<1x6x16xbf16> to vector<6x16xbf16>
    %cst_133 = arith.constant dense<0.000000e+00> : vector<32x16xf32>
    %114 = tpu.matmul %111, %113, %cst_133 {dimension_numbers = #tpu.dot_dimension_numbers<[1], [0], [0], [1], [0, 0, 1, 1], [], []>} : vector<32x6xbf16>, vector<6x16xbf16>, vector<32x16xf32> -> vector<32x16xf32>
    %115 = arith.addf %109, %114 : vector<32x16xf32>
    %c0_134 = arith.constant 0 : index
    %c4_135 = arith.constant 4 : index
    %c2_136 = arith.constant 2 : index
    %c0_137 = arith.constant 0 : index
    %116 = vector.load %arg3[%c0_134, %c4_135, %c2_136, %c0_137] : memref<1x8x34x6xbf16, #tpu.memory_space<vmem>>, vector<1x1x32x6xbf16>
    %117 = vector.shape_cast %116 : vector<1x1x32x6xbf16> to vector<32x6xbf16>
    %c0_138 = arith.constant 0 : index
    %c12_139 = arith.constant 12 : index
    %c0_140 = arith.constant 0 : index
    %118 = vector.load %arg4[%c0_138, %c12_139, %c0_140] : memref<1x18x16xbf16, #tpu.memory_space<vmem>>, vector<1x6x16xbf16>
    %119 = vector.shape_cast %118 : vector<1x6x16xbf16> to vector<6x16xbf16>
    %cst_141 = arith.constant dense<0.000000e+00> : vector<32x16xf32>
    %120 = tpu.matmul %117, %119, %cst_141 {dimension_numbers = #tpu.dot_dimension_numbers<[1], [0], [0], [1], [0, 0, 1, 1], [], []>} : vector<32x6xbf16>, vector<6x16xbf16>, vector<32x16xf32> -> vector<32x16xf32>
    %121 = arith.addf %115, %120 : vector<32x16xf32>
    %c4_142 = arith.constant 4 : index
    %c0_143 = arith.constant 0 : index
    %c0_144 = arith.constant 0 : index
    %122 = vector.load %arg7[%c4_142, %c0_143, %c0_144] : memref<8x32x16xf32, #tpu.memory_space<vmem>>, vector<1x32x16xf32>
    %123 = vector.shape_cast %122 : vector<1x32x16xf32> to vector<32x16xf32>
    %124 = arith.addf %123, %121 : vector<32x16xf32>
    %c4_145 = arith.constant 4 : index
    %c0_146 = arith.constant 0 : index
    %c0_147 = arith.constant 0 : index
    %125 = vector.load %arg7[%c4_145, %c0_146, %c0_147] : memref<8x32x16xf32, #tpu.memory_space<vmem>>, vector<1x32x16xf32>
    %126 = vector.shape_cast %125 : vector<1x32x16xf32> to vector<32x16xf32>
    %127 = vector.shape_cast %124 : vector<32x16xf32> to vector<1x32x16xf32>
    tpu.vector_store %arg7[%c4_145, %c0_146, %c0_147], %127 {strides = array<i32>} : memref<8x32x16xf32, #tpu.memory_space<vmem>>, vector<1x32x16xf32>,
    %cst_148 = arith.constant 0.000000e+00 : f32
    %128 = vector.broadcast %cst_148 : f32 to vector<32x16xf32>
    %c0_149 = arith.constant 0 : index
    %c5 = arith.constant 5 : index
    %c0_150 = arith.constant 0 : index
    %c0_151 = arith.constant 0 : index
    %129 = vector.load %arg3[%c0_149, %c5, %c0_150, %c0_151] : memref<1x8x34x6xbf16, #tpu.memory_space<vmem>>, vector<1x1x32x6xbf16>
    %130 = vector.shape_cast %129 : vector<1x1x32x6xbf16> to vector<32x6xbf16>
    %c0_152 = arith.constant 0 : index
    %c0_153 = arith.constant 0 : index
    %c0_154 = arith.constant 0 : index
    %131 = vector.load %arg4[%c0_152, %c0_153, %c0_154] : memref<1x18x16xbf16, #tpu.memory_space<vmem>>, vector<1x6x16xbf16>
    %132 = vector.shape_cast %131 : vector<1x6x16xbf16> to vector<6x16xbf16>
    %cst_155 = arith.constant dense<0.000000e+00> : vector<32x16xf32>
    %133 = tpu.matmul %130, %132, %cst_155 {dimension_numbers = #tpu.dot_dimension_numbers<[1], [0], [0], [1], [0, 0, 1, 1], [], []>} : vector<32x6xbf16>, vector<6x16xbf16>, vector<32x16xf32> -> vector<32x16xf32>
    %134 = arith.addf %128, %133 : vector<32x16xf32>
    %c0_156 = arith.constant 0 : index
    %c5_157 = arith.constant 5 : index
    %c1_158 = arith.constant 1 : index
    %c0_159 = arith.constant 0 : index
    %135 = vector.load %arg3[%c0_156, %c5_157, %c1_158, %c0_159] : memref<1x8x34x6xbf16, #tpu.memory_space<vmem>>, vector<1x1x32x6xbf16>
    %136 = vector.shape_cast %135 : vector<1x1x32x6xbf16> to vector<32x6xbf16>
    %c0_160 = arith.constant 0 : index
    %c6_161 = arith.constant 6 : index
    %c0_162 = arith.constant 0 : index
    %137 = vector.load %arg4[%c0_160, %c6_161, %c0_162] : memref<1x18x16xbf16, #tpu.memory_space<vmem>>, vector<1x6x16xbf16>
    %138 = vector.shape_cast %137 : vector<1x6x16xbf16> to vector<6x16xbf16>
    %cst_163 = arith.constant dense<0.000000e+00> : vector<32x16xf32>
    %139 = tpu.matmul %136, %138, %cst_163 {dimension_numbers = #tpu.dot_dimension_numbers<[1], [0], [0], [1], [0, 0, 1, 1], [], []>} : vector<32x6xbf16>, vector<6x16xbf16>, vector<32x16xf32> -> vector<32x16xf32>
    %140 = arith.addf %134, %139 : vector<32x16xf32>
    %c0_164 = arith.constant 0 : index
    %c5_165 = arith.constant 5 : index
    %c2_166 = arith.constant 2 : index
    %c0_167 = arith.constant 0 : index
    %141 = vector.load %arg3[%c0_164, %c5_165, %c2_166, %c0_167] : memref<1x8x34x6xbf16, #tpu.memory_space<vmem>>, vector<1x1x32x6xbf16>
    %142 = vector.shape_cast %141 : vector<1x1x32x6xbf16> to vector<32x6xbf16>
    %c0_168 = arith.constant 0 : index
    %c12_169 = arith.constant 12 : index
    %c0_170 = arith.constant 0 : index
    %143 = vector.load %arg4[%c0_168, %c12_169, %c0_170] : memref<1x18x16xbf16, #tpu.memory_space<vmem>>, vector<1x6x16xbf16>
    %144 = vector.shape_cast %143 : vector<1x6x16xbf16> to vector<6x16xbf16>
    %cst_171 = arith.constant dense<0.000000e+00> : vector<32x16xf32>
    %145 = tpu.matmul %142, %144, %cst_171 {dimension_numbers = #tpu.dot_dimension_numbers<[1], [0], [0], [1], [0, 0, 1, 1], [], []>} : vector<32x6xbf16>, vector<6x16xbf16>, vector<32x16xf32> -> vector<32x16xf32>
    %146 = arith.addf %140, %145 : vector<32x16xf32>
    %c5_172 = arith.constant 5 : index
    %c0_173 = arith.constant 0 : index
    %c0_174 = arith.constant 0 : index
    %147 = vector.load %arg7[%c5_172, %c0_173, %c0_174] : memref<8x32x16xf32, #tpu.memory_space<vmem>>, vector<1x32x16xf32>
    %148 = vector.shape_cast %147 : vector<1x32x16xf32> to vector<32x16xf32>
    %149 = arith.addf %148, %146 : vector<32x16xf32>
    %c5_175 = arith.constant 5 : index
    %c0_176 = arith.constant 0 : index
    %c0_177 = arith.constant 0 : index
    %150 = vector.load %arg7[%c5_175, %c0_176, %c0_177] : memref<8x32x16xf32, #tpu.memory_space<vmem>>, vector<1x32x16xf32>
    %151 = vector.shape_cast %150 : vector<1x32x16xf32> to vector<32x16xf32>
    %152 = vector.shape_cast %149 : vector<32x16xf32> to vector<1x32x16xf32>
    tpu.vector_store %arg7[%c5_175, %c0_176, %c0_177], %152 {strides = array<i32>} : memref<8x32x16xf32, #tpu.memory_space<vmem>>, vector<1x32x16xf32>,
    %cst_178 = arith.constant 0.000000e+00 : f32
    %153 = vector.broadcast %cst_178 : f32 to vector<32x16xf32>
    %c0_179 = arith.constant 0 : index
    %c6_180 = arith.constant 6 : index
    %c0_181 = arith.constant 0 : index
    %c0_182 = arith.constant 0 : index
    %154 = vector.load %arg3[%c0_179, %c6_180, %c0_181, %c0_182] : memref<1x8x34x6xbf16, #tpu.memory_space<vmem>>, vector<1x1x32x6xbf16>
    %155 = vector.shape_cast %154 : vector<1x1x32x6xbf16> to vector<32x6xbf16>
    %c0_183 = arith.constant 0 : index
    %c0_184 = arith.constant 0 : index
    %c0_185 = arith.constant 0 : index
    %156 = vector.load %arg4[%c0_183, %c0_184, %c0_185] : memref<1x18x16xbf16, #tpu.memory_space<vmem>>, vector<1x6x16xbf16>
    %157 = vector.shape_cast %156 : vector<1x6x16xbf16> to vector<6x16xbf16>
    %cst_186 = arith.constant dense<0.000000e+00> : vector<32x16xf32>
    %158 = tpu.matmul %155, %157, %cst_186 {dimension_numbers = #tpu.dot_dimension_numbers<[1], [0], [0], [1], [0, 0, 1, 1], [], []>} : vector<32x6xbf16>, vector<6x16xbf16>, vector<32x16xf32> -> vector<32x16xf32>
    %159 = arith.addf %153, %158 : vector<32x16xf32>
    %c0_187 = arith.constant 0 : index
    %c6_188 = arith.constant 6 : index
    %c1_189 = arith.constant 1 : index
    %c0_190 = arith.constant 0 : index
    %160 = vector.load %arg3[%c0_187, %c6_188, %c1_189, %c0_190] : memref<1x8x34x6xbf16, #tpu.memory_space<vmem>>, vector<1x1x32x6xbf16>
    %161 = vector.shape_cast %160 : vector<1x1x32x6xbf16> to vector<32x6xbf16>
    %c0_191 = arith.constant 0 : index
    %c6_192 = arith.constant 6 : index
    %c0_193 = arith.constant 0 : index
    %162 = vector.load %arg4[%c0_191, %c6_192, %c0_193] : memref<1x18x16xbf16, #tpu.memory_space<vmem>>, vector<1x6x16xbf16>
    %163 = vector.shape_cast %162 : vector<1x6x16xbf16> to vector<6x16xbf16>
    %cst_194 = arith.constant dense<0.000000e+00> : vector<32x16xf32>
    %164 = tpu.matmul %161, %163, %cst_194 {dimension_numbers = #tpu.dot_dimension_numbers<[1], [0], [0], [1], [0, 0, 1, 1], [], []>} : vector<32x6xbf16>, vector<6x16xbf16>, vector<32x16xf32> -> vector<32x16xf32>
    %165 = arith.addf %159, %164 : vector<32x16xf32>
    %c0_195 = arith.constant 0 : index
    %c6_196 = arith.constant 6 : index
    %c2_197 = arith.constant 2 : index
    %c0_198 = arith.constant 0 : index
    %166 = vector.load %arg3[%c0_195, %c6_196, %c2_197, %c0_198] : memref<1x8x34x6xbf16, #tpu.memory_space<vmem>>, vector<1x1x32x6xbf16>
    %167 = vector.shape_cast %166 : vector<1x1x32x6xbf16> to vector<32x6xbf16>
    %c0_199 = arith.constant 0 : index
    %c12_200 = arith.constant 12 : index
    %c0_201 = arith.constant 0 : index
    %168 = vector.load %arg4[%c0_199, %c12_200, %c0_201] : memref<1x18x16xbf16, #tpu.memory_space<vmem>>, vector<1x6x16xbf16>
    %169 = vector.shape_cast %168 : vector<1x6x16xbf16> to vector<6x16xbf16>
    %cst_202 = arith.constant dense<0.000000e+00> : vector<32x16xf32>
    %170 = tpu.matmul %167, %169, %cst_202 {dimension_numbers = #tpu.dot_dimension_numbers<[1], [0], [0], [1], [0, 0, 1, 1], [], []>} : vector<32x6xbf16>, vector<6x16xbf16>, vector<32x16xf32> -> vector<32x16xf32>
    %171 = arith.addf %165, %170 : vector<32x16xf32>
    %c6_203 = arith.constant 6 : index
    %c0_204 = arith.constant 0 : index
    %c0_205 = arith.constant 0 : index
    %172 = vector.load %arg7[%c6_203, %c0_204, %c0_205] : memref<8x32x16xf32, #tpu.memory_space<vmem>>, vector<1x32x16xf32>
    %173 = vector.shape_cast %172 : vector<1x32x16xf32> to vector<32x16xf32>
    %174 = arith.addf %173, %171 : vector<32x16xf32>
    %c6_206 = arith.constant 6 : index
    %c0_207 = arith.constant 0 : index
    %c0_208 = arith.constant 0 : index
    %175 = vector.load %arg7[%c6_206, %c0_207, %c0_208] : memref<8x32x16xf32, #tpu.memory_space<vmem>>, vector<1x32x16xf32>
    %176 = vector.shape_cast %175 : vector<1x32x16xf32> to vector<32x16xf32>
    %177 = vector.shape_cast %174 : vector<32x16xf32> to vector<1x32x16xf32>
    tpu.vector_store %arg7[%c6_206, %c0_207, %c0_208], %177 {strides = array<i32>} : memref<8x32x16xf32, #tpu.memory_space<vmem>>, vector<1x32x16xf32>,
    %cst_209 = arith.constant 0.000000e+00 : f32
    %178 = vector.broadcast %cst_209 : f32 to vector<32x16xf32>
    %c0_210 = arith.constant 0 : index
    %c7 = arith.constant 7 : index
    %c0_211 = arith.constant 0 : index
    %c0_212 = arith.constant 0 : index
    %179 = vector.load %arg3[%c0_210, %c7, %c0_211, %c0_212] : memref<1x8x34x6xbf16, #tpu.memory_space<vmem>>, vector<1x1x32x6xbf16>
    %180 = vector.shape_cast %179 : vector<1x1x32x6xbf16> to vector<32x6xbf16>
    %c0_213 = arith.constant 0 : index
    %c0_214 = arith.constant 0 : index
    %c0_215 = arith.constant 0 : index
    %181 = vector.load %arg4[%c0_213, %c0_214, %c0_215] : memref<1x18x16xbf16, #tpu.memory_space<vmem>>, vector<1x6x16xbf16>
    %182 = vector.shape_cast %181 : vector<1x6x16xbf16> to vector<6x16xbf16>
    %cst_216 = arith.constant dense<0.000000e+00> : vector<32x16xf32>
    %183 = tpu.matmul %180, %182, %cst_216 {dimension_numbers = #tpu.dot_dimension_numbers<[1], [0], [0], [1], [0, 0, 1, 1], [], []>} : vector<32x6xbf16>, vector<6x16xbf16>, vector<32x16xf32> -> vector<32x16xf32>
    %184 = arith.addf %178, %183 : vector<32x16xf32>
    %c0_217 = arith.constant 0 : index
    %c7_218 = arith.constant 7 : index
    %c1_219 = arith.constant 1 : index
    %c0_220 = arith.constant 0 : index
    %185 = vector.load %arg3[%c0_217, %c7_218, %c1_219, %c0_220] : memref<1x8x34x6xbf16, #tpu.memory_space<vmem>>, vector<1x1x32x6xbf16>
    %186 = vector.shape_cast %185 : vector<1x1x32x6xbf16> to vector<32x6xbf16>
    %c0_221 = arith.constant 0 : index
    %c6_222 = arith.constant 6 : index
    %c0_223 = arith.constant 0 : index
    %187 = vector.load %arg4[%c0_221, %c6_222, %c0_223] : memref<1x18x16xbf16, #tpu.memory_space<vmem>>, vector<1x6x16xbf16>
    %188 = vector.shape_cast %187 : vector<1x6x16xbf16> to vector<6x16xbf16>
    %cst_224 = arith.constant dense<0.000000e+00> : vector<32x16xf32>
    %189 = tpu.matmul %186, %188, %cst_224 {dimension_numbers = #tpu.dot_dimension_numbers<[1], [0], [0], [1], [0, 0, 1, 1], [], []>} : vector<32x6xbf16>, vector<6x16xbf16>, vector<32x16xf32> -> vector<32x16xf32>
    %190 = arith.addf %184, %189 : vector<32x16xf32>
    %c0_225 = arith.constant 0 : index
    %c7_226 = arith.constant 7 : index
    %c2_227 = arith.constant 2 : index
    %c0_228 = arith.constant 0 : index
    %191 = vector.load %arg3[%c0_225, %c7_226, %c2_227, %c0_228] : memref<1x8x34x6xbf16, #tpu.memory_space<vmem>>, vector<1x1x32x6xbf16>
    %192 = vector.shape_cast %191 : vector<1x1x32x6xbf16> to vector<32x6xbf16>
    %c0_229 = arith.constant 0 : index
    %c12_230 = arith.constant 12 : index
    %c0_231 = arith.constant 0 : index
    %193 = vector.load %arg4[%c0_229, %c12_230, %c0_231] : memref<1x18x16xbf16, #tpu.memory_space<vmem>>, vector<1x6x16xbf16>
    %194 = vector.shape_cast %193 : vector<1x6x16xbf16> to vector<6x16xbf16>
    %cst_232 = arith.constant dense<0.000000e+00> : vector<32x16xf32>
    %195 = tpu.matmul %192, %194, %cst_232 {dimension_numbers = #tpu.dot_dimension_numbers<[1], [0], [0], [1], [0, 0, 1, 1], [], []>} : vector<32x6xbf16>, vector<6x16xbf16>, vector<32x16xf32> -> vector<32x16xf32>
    %196 = arith.addf %190, %195 : vector<32x16xf32>
    %c7_233 = arith.constant 7 : index
    %c0_234 = arith.constant 0 : index
    %c0_235 = arith.constant 0 : index
    %197 = vector.load %arg7[%c7_233, %c0_234, %c0_235] : memref<8x32x16xf32, #tpu.memory_space<vmem>>, vector<1x32x16xf32>
    %198 = vector.shape_cast %197 : vector<1x32x16xf32> to vector<32x16xf32>
    %199 = arith.addf %198, %196 : vector<32x16xf32>
    %c7_236 = arith.constant 7 : index
    %c0_237 = arith.constant 0 : index
    %c0_238 = arith.constant 0 : index
    %200 = vector.load %arg7[%c7_236, %c0_237, %c0_238] : memref<8x32x16xf32, #tpu.memory_space<vmem>>, vector<1x32x16xf32>
    %201 = vector.shape_cast %200 : vector<1x32x16xf32> to vector<32x16xf32>
    %202 = vector.shape_cast %199 : vector<32x16xf32> to vector<1x32x16xf32>
    tpu.vector_store %arg7[%c7_236, %c0_237, %c0_238], %202 {strides = array<i32>} : memref<8x32x16xf32, #tpu.memory_space<vmem>>, vector<1x32x16xf32>,
    %c2_i32 = arith.constant 2 : i32
    %203 = arith.cmpi eq, %arg2, %c2_i32 : i32
    %204 = arith.extui %203 : i1 to i32
    %c0_i32_239 = arith.constant 0 : i32
    %205 = arith.cmpi ne, %204, %c0_i32_239 : i32
    scf.if %205 {
      %c0_240 = arith.constant 0 : index
      %c0_241 = arith.constant 0 : index
      %c0_242 = arith.constant 0 : index
      %206 = vector.load %arg7[%c0_240, %c0_241, %c0_242] : memref<8x32x16xf32, #tpu.memory_space<vmem>>, vector<8x32x16xf32>
      %c0_243 = arith.constant 0 : index
      %c0_244 = arith.constant 0 : index
      %207 = vector.load %arg5[%c0_243, %c0_244] : memref<1x16xf32, #tpu.memory_space<vmem>>, vector<1x16xf32>
      %208 = vector.shape_cast %207 : vector<1x16xf32> to vector<16xf32>
      %209 = vector.shape_cast %208 : vector<16xf32> to vector<1x1x16xf32>
      %210 = vector.broadcast %209 : vector<1x1x16xf32> to vector<8x32x16xf32>
      %211 = arith.addf %206, %210 : vector<8x32x16xf32>
      %cst_245 = arith.constant 0.000000e+00 : f32
      %212 = vector.broadcast %cst_245 : f32 to vector<8x32x16xf32>
      %213 = arith.maximumf %211, %212 : vector<8x32x16xf32>
      %214 = arith.truncf %213 : vector<8x32x16xf32> to vector<8x32x16xbf16>
      %c0_246 = arith.constant 0 : index
      %c0_247 = arith.constant 0 : index
      %c0_248 = arith.constant 0 : index
      %215 = vector.load %arg6[%c0_246, %c0_247, %c0_248] : memref<8x32x16xbf16, #tpu.memory_space<vmem>>, vector<8x32x16xbf16>
      tpu.vector_store %arg6[%c0_246, %c0_247, %c0_248], %214 {strides = array<i32>} : memref<8x32x16xbf16, #tpu.memory_space<vmem>>, vector<8x32x16xbf16>,
    } else {
    }
    return
  }
  func.func @transform_0(%arg0: i32, %arg1: i32, %arg2: i32) -> (i32, i32, i32, i32) {
    %c0_i32 = arith.constant 0 : i32
    %c0_i32_0 = arith.constant 0 : i32
    %c0_i32_1 = arith.constant 0 : i32
    return %arg2, %arg0, %c0_i32, %c0_i32_0 : i32, i32, i32, i32
  }
  func.func @transform_1(%arg0: i32, %arg1: i32, %arg2: i32) -> (i32, i32, i32) {
    %c0_i32 = arith.constant 0 : i32
    %c0_i32_0 = arith.constant 0 : i32
    return %arg2, %c0_i32, %arg1 : i32, i32, i32
  }
  func.func @transform_2(%arg0: i32, %arg1: i32, %arg2: i32) -> (i32, i32) {
    %c0_i32 = arith.constant 0 : i32
    %c0_i32_0 = arith.constant 0 : i32
    return %c0_i32, %arg1 : i32, i32
  }
  func.func @transform_3(%arg0: i32, %arg1: i32, %arg2: i32) -> (i32, i32, i32) {
    %c0_i32 = arith.constant 0 : i32
    %c0_i32_0 = arith.constant 0 : i32
    return %arg0, %c0_i32, %arg1 : i32, i32, i32
  }
}

</mosaic_0001>

<bundles_post_ra>
// kernel: tpu_custom_call.1
= control target key start
LH: loop header
LB: loop body
LE: loop exit
PB: predicated region body
PF: predicated region fallthrough
CT: control target
= control target key end

     0   :  { %s3409_s12 = smov 0   ;;  %s3411_s13 = smov 0   ;;  %s3974_s0 = inlined_call_operand.vmem [shape: bf16[3,32,34,6], index: 0, kind: input, shape index: {}]   ;;  %s3975_s1 = inlined_call_operand.vmem [shape: bf16[3,18,16], index: 1, kind: input, shape index: {}]   ;;  %s3976_s2 = inlined_call_operand.vmem [shape: f32[1,16], index: 2, kind: input, shape index: {}]   ;;  %s3977_s3 = inlined_call_operand.vmem [shape: bf16[32,32,16], index: 3, kind: output, shape index: {}]  }
   0x1   :  { %s3413_s14 = smov 0   ;;  %s3415_s15 = smov 0  }
   0x2   :  { %s3417_s16 = smov 0  }
   0x3 LB: > { %s25_s17 = sadd.s32 1, %s3378_s14  ;;  %s32_s18 = sadd.s32 1, %s3382_s15  ;;  %s3386_s16 = sphi %s3417_s16, %s13_s16   ;;  %s3382_s15 = sphi %s3415_s15, %s3981_s15   ;;  %s3378_s14 = sphi %s3413_s14, %s3980_s14   ;;  %s3374_s13 = sphi %s3411_s13, %s3979_s13   ;;  %s3370_s12 = sphi %s3409_s12, %s3978_s12  }
   0x4   : > { %p26_p0 = scmp.ge.s32.totalorder %s25_s17, 3  ;;  %p2737_p1 = scmp.ge.s32.totalorder %s3386_s16, 1 }
   0x5   : > { %p189_p2 = scmp.lt.s32.totalorder %s3386_s16, 13 }
   0x6   : > { %s3983_s17 = smov (%p26_p0, %s25_s17), 0  ;;  %s3985_s18 = smov (!%p26_p0, %s32_s18), %s3382_s15 }
   0x7   : > { %p190_p3 = pnand %p2737_p1, %p189_p2  ;;  %p34_p4 = scmp.ge.s32.totalorder %s3985_s18, 4 }
   0x8   : > { %s2738_s19 = sshll.u32 (!%p190_p3), %s3374_s13, 3  ;;  %p234_p5 = scmp.lt.s32.totalorder (!%p190_p3), %s3370_s12, 2 }
   0x9   : > { %s3987_s18 = smov (%p34_p4, %s3985_s18), 0  ;;  %193 = sbr.rel (%p190_p3) target bundleno = 403 (0x193), region = 32 }
   0xa   : > { %p236_p6 = scmp.lt.s32.totalorder (!%p190_p3), %s2738_s19, 31  ;;  %p2744_p7 = scmp.ne.s32.totalorder (!%p190_p3), %s3370_s12, 0 }
  0x10   : > { %s235_s20 = scalar_select %p234_p5, %s3370_s12, 2 }
  0x11   : > { %s3989_s19 = smov (!%p236_p6, %s2738_s19), 31  ;;  %269 = sbr.rel (%p2744_p7) target bundleno = 35 (0x23), region = 36 }
  0x12   : > { %s3257_s21 = smul.u32 160, %s235_s20  ;;  %s2919_s23 = sshll.u32 %s3989_s19, 4  ;;  %vm270_vm0 = vcmask (!%p2744_p7), 130048   ;;  %v3388_v0 = vmov (!%p2744_p7), 0.0  }
  0x13   : > { %s3256_s22 = smul.u32 5, %s3989_s19  ;;  %s3446_s27 = scalar_lea.vmem %s3977_s3, %s2919_s23  ;;  %271 = vst.msk [vmem:[#allocation2] sm:$0xff] (!%p2744_p7), %vm270_vm0, %v3388_v0  ;;  %272 = vst.msk [vmem:[#allocation2 + $0x8] sm:$0xff] (!%p2744_p7), %vm270_vm0, %v3388_v0 }
  0x14   : > { %s3258_s24 = smul.u32 12, %s235_s20  ;;  %273 = vst.msk [vmem:[#allocation2 + $0x10] sm:$0xff] (!%p2744_p7), %vm270_vm0, %v3388_v0  ;;  %274 = vst.msk [vmem:[#allocation2 + $0x18] sm:$0xff] (!%p2744_p7), %vm270_vm0, %v3388_v0 }
  0x15   : > { %s240_s28 = sadd.s32 %s3257_s21, %s3256_s22  ;;  %275 = vst.msk [vmem:[#allocation2 + $0x20] sm:$0xff] (!%p2744_p7), %vm270_vm0, %v3388_v0  ;;  %276 = vst.msk [vmem:[#allocation2 + $0x28] sm:$0xff] (!%p2744_p7), %vm270_vm0, %v3388_v0 }
  0x16   : > { %s2739_s29 = sshll.u32 %s240_s28, 2  ;;  %s3451_s5 = scalar_lea.vmem %s3975_s1, %s3258_s24  ;;  %277 = vst.msk [vmem:[#allocation2 + $0x30] sm:$0xff] (!%p2744_p7), %vm270_vm0, %v3388_v0  ;;  %278 = vst.msk [vmem:[#allocation2 + $0x38] sm:$0xff] (!%p2744_p7), %vm270_vm0, %v3388_v0 }
  0x17   : > { %s3456_s8 = scalar_lea.vmem %s3974_s0, %s2739_s29  ;;  %279 = vst.msk [vmem:[#allocation2 + $0x40] sm:$0xff] (!%p2744_p7), %vm270_vm0, %v3388_v0  ;;  %280 = vst.msk [vmem:[#allocation2 + $0x48] sm:$0xff] (!%p2744_p7), %vm270_vm0, %v3388_v0 }
  0x18   : > { %281 = vst.msk [vmem:[#allocation2 + $0x50] sm:$0xff] %vm270_vm0, %v3388_v0  ;;  %282 = vst.msk [vmem:[#allocation2 + $0x58] sm:$0xff] %vm270_vm0, %v3388_v0 }
  0x19   : > { %283 = vst.msk [vmem:[#allocation2 + $0x60] sm:$0xff] %vm270_vm0, %v3388_v0  ;;  %284 = vst.msk [vmem:[#allocation2 + $0x68] sm:$0xff] %vm270_vm0, %v3388_v0 }
  0x1a   : > { %285 = vst.msk [vmem:[#allocation2 + $0x70] sm:$0xff] %vm270_vm0, %v3388_v0  ;;  %286 = vst.msk [vmem:[#allocation2 + $0x78] sm:$0xff] %vm270_vm0, %v3388_v0 }
  0x1b   : > { %287 = vst.msk [vmem:[#allocation2 + $0x80] sm:$0xff] %vm270_vm0, %v3388_v0  ;;  %288 = vst.msk [vmem:[#allocation2 + $0x88] sm:$0xff] %vm270_vm0, %v3388_v0 }
  0x1c   : > { %289 = vst.msk [vmem:[#allocation2 + $0x90] sm:$0xff] %vm270_vm0, %v3388_v0  ;;  %290 = vst.msk [vmem:[#allocation2 + $0x98] sm:$0xff] %vm270_vm0, %v3388_v0 }
  0x1d   : > { %291 = vst.msk [vmem:[#allocation2 + $0xa0] sm:$0xff] %vm270_vm0, %v3388_v0  ;;  %292 = vst.msk [vmem:[#allocation2 + $0xa8] sm:$0xff] %vm270_vm0, %v3388_v0 }
  0x1e   : > { %293 = vst.msk [vmem:[#allocation2 + $0xb0] sm:$0xff] %vm270_vm0, %v3388_v0  ;;  %294 = vst.msk [vmem:[#allocation2 + $0xb8] sm:$0xff] %vm270_vm0, %v3388_v0 }
  0x1f   : > { %295 = vst.msk [vmem:[#allocation2 + $0xc0] sm:$0xff] %vm270_vm0, %v3388_v0  ;;  %296 = vst.msk [vmem:[#allocation2 + $0xc8] sm:$0xff] %vm270_vm0, %v3388_v0 }
  0x20   : > { %297 = vst.msk [vmem:[#allocation2 + $0xd0] sm:$0xff] %vm270_vm0, %v3388_v0  ;;  %298 = vst.msk [vmem:[#allocation2 + $0xd8] sm:$0xff] %vm270_vm0, %v3388_v0 }
  0x21   : > { %299 = vst.msk [vmem:[#allocation2 + $0xe0] sm:$0xff] %vm270_vm0, %v3388_v0  ;;  %300 = vst.msk [vmem:[#allocation2 + $0xe8] sm:$0xff] %vm270_vm0, %v3388_v0 }
  0x22   : > { %301 = vst.msk [vmem:[#allocation2 + $0xf0] sm:$0xff] %vm270_vm0, %v3388_v0  ;;  %302 = vst.msk [vmem:[#allocation2 + $0xf8] sm:$0xff] %vm270_vm0, %v3388_v0 }
  0x23 PF: > { %v3300_v1 = vld [vmem:[%s3451_s5] sm:$0x38]   ;;  %vm358_vm1 = vcmask 1042432   ;;  %v3493_v2 = vld [vmem:[%s3456_s8 + $0x8] sm:$0xff]   ;;  %vm324_vm2 = vsmask.f32 7424 }
  0x24   : > { %v350_v3 = vrot.slane %v3300_v1, 3  ;;  %v3301_v4 = vld [vmem:[%s3451_s5] sm:$0x38]   ;;  %v307_v10 = vld [vmem:[%s3451_s5] sm:$0x7]  ;;  %v333_v11 = vshll.u32 %v3493_v2, 16 }
  0x25   : > { %v303_v5 = vld [vmem:[%s3456_s8] sm:$0xf]  ;;  %v3498_v6 = vld [vmem:[%s3456_s8 + $0x4] sm:$0xf]  ;;  %v607_v7 = vrot.slane %v3301_v4, 3  ;;  %v337_v20 = vshrl.u32 %v3493_v2, 16 }
  0x26   : > { %3232 = vmatprep.subr.msk.bf16.mxu0 %vm358_vm1, %v350_v3  ;;  %v360_v8 = vsel %vm358_vm1, %v350_v3, 0  ;;  %v2745_v9 = vcombine.low %v303_v5, %v3498_v6  ;;  %v2757_v12 = vld [vmem:[%s3456_s8 + $0x14] sm:$0xf]  ;;  %v3507_v13 = vld [vmem:[%s3456_s8 + $0x18] sm:$0xf]  ;;  %v3514_v18 = vld [vmem:[%s3456_s8 + $0x1c] sm:$0xff]  }
  0x27   : > { %3025 = vmatpush3.bf16.msra.mxu0 %v360_v8  ;;  %3235 = vmatprep.subr.msk.bf16.mxu1 %vm358_vm1, %v607_v7  ;;  %v615_v14 = vsel %vm358_vm1, %v607_v7, 0  ;;  %v2762_v17 = vcombine.low %v2757_v12, %v3507_v13  ;;  %v335_v19 = vrot.slane %v333_v11, 1  ;;  %v565_v21 = vld [vmem:[%s3451_s5] sm:$0x7]  ;;  %v590_v25 = vshll.u32 %v3514_v18, 16  ;;  %v3569_v3 = vld [vmem:[%s3456_s8 + $0x30] sm:$0xff]  }
  0x28   : > { %v326_v15 = vshrl.u32 %v2745_v9, 16  ;;  %v328_v16 = vshll.u32 %v2745_v9, 16  ;;  %3233 = vmatprep.subr.msk.bf16.mxu0 %vm358_vm1, %v307_v10  ;;  %3043 = vmatpush3.bf16.msra.mxu1 %v615_v14  ;;  %v594_v26 = vshrl.u32 %v3514_v18, 16  ;;  %v3522_v27 = vld [vmem:[%s3456_s8 + $0x10] ss:$0 sps:$4 sm:$0x11]  }
  0x29   : > { %v583_v23 = vshrl.u32 %v2762_v17, 16  ;;  %v585_v24 = vshll.u32 %v2762_v17, 16  ;;  %3236 = vmatprep.subr.msk.bf16.mxu1 %vm358_vm1, %v565_v21  ;;  %vm351_vm3 = vcmask 48128   ;;  %v592_v30 = vrot.slane %v590_v25, 1  ;;  %v3308_v38 = vld [vmem:[%s3451_s5 + $0x4] sm:$0x1c]  }
  0x2a   : > { %v330_v22 = vrot.slane %v328_v16, 1  ;;  %v3525_v31 = vld [vmem:[%s3456_s8 + $0x24] ss:$0 sps:$4 sm:$0x11]   ;;  %v339_v32 = vor.u32 %v337_v20, %v335_v19  ;;  %v341_v33 = vshll.u32 %v3522_v27, 16  ;;  %v416_v42 = vsel %vm358_vm1, %v307_v10, 0 }
  0x2b   : > { %v587_v29 = vrot.slane %v585_v24, 1  ;;  %v596_v36 = vor.u32 %v594_v26, %v592_v30  ;;  %v598_v37 = vshll.u32 %v3525_v31, 16  ;;  %v3309_v40 = vld [vmem:[%s3451_s5 + $0x4] sm:$0x1c]   ;;  %v671_v45 = vsel %vm358_vm1, %v565_v21, 0  ;;  %p2883_p8 = scmp.ne.s32.totalorder %s3370_s12, 2 }
  0x2c   : > { %v331_v28 = vor.u32 %v330_v22, %v326_v15  ;;  %v343_v39 = vrot.slane %v341_v33, 1  ;;  %v484_v46 = vrot.slane %v3308_v38, 2  ;;  %v738_v48 = vrot.slane %v3309_v40, 2  ;;  %v467_v49 = vld [vmem:[%s3456_s8] sm:$0xe]  ;;  %v3575_v8 = vld [vmem:[%s3456_s8 + $0x44] sm:$0xff]  }
  0x2d   : > { %v588_v35 = vor.u32 %v587_v29, %v583_v23  ;;  %v600_v43 = vrot.slane %v598_v37, 1  ;;  %v2770_v50 = vld [vmem:[%s3456_s8 + $0x14] sm:$0xe]  ;;  %v2753_v51 = vcombine.low %v467_v49, %v3498_v6  ;;  %v2775_v53 = vld [vmem:[%s3456_s8 + $0x28] sm:$0xf]  ;;  %vm473_vm4 = vcmask 1046528  }
  0x2e   : > { %v336_v34 = vsel %vm324_vm2, %v331_v28, %v335_v19  ;;  %v344_v44 = vsel %vm324_vm2, %v339_v32, %v343_v39  ;;  %v2771_v52 = vcombine.low %v2770_v50, %v3507_v13  ;;  %v3551_v54 = vld [vmem:[%s3456_s8 + $0x2c] sm:$0xf]  ;;  %v2793_v55 = vld [vmem:[%s3456_s8 + $0x3c] sm:$0xf]  ;;  %v3555_v56 = vld [vmem:[%s3456_s8 + $0x40] sm:$0xf] }
  0x2f   : > { %3026 = vmatprep.mubr.msk.bf16.mxu0 %vm351_vm3, %v336_v34  ;;  %v593_v41 = vsel %vm324_vm2, %v588_v35, %v592_v30  ;;  %v601_v47 = vsel %vm324_vm2, %v596_v36, %v600_v43  ;;  %v474_v57 = vrot.slane %v2753_v51, 1  ;;  %v475_v58 = vrot.slane %v3493_v2, 1  ;;  %v3312_v59 = vld [vmem:[%s3451_s5] sm:$0x38]   ;;  %v819_v34 = vld [vmem:[%s3451_s5] sm:$0x7] }
  0x30   : > { %3044 = vmatprep.mubr.msk.bf16.mxu1 %vm351_vm3, %v593_v41  ;;  %3027 = vmatmul.mubr.msk.bf16.vlgmr.msra.gmra.mrb[0].mxu0 %vm351_vm3, %v344_v44  ;;  %v3560_v60 = vcombine.low %v2775_v53, %v3551_v54  ;;  %v728_v61 = vrot.slane %v2771_v52, 1  ;;  %v729_v62 = vrot.slane %v3514_v18, 1  ;;  %v3313_v63 = vld [vmem:[%s3451_s5] sm:$0x38]   ;;  %v3565_v0 = vcombine.low %v2793_v55, %v3555_v56  ;;  %v1073_v37 = vld [vmem:[%s3451_s5] sm:$0x7] }
  0x31   : > { %3031 = vmatpush3.bf16.msra.mxu0 %v416_v42  ;;  %3045 = vmatmul.mubr.msk.bf16.vlgmr.msra.gmra.mrb[0].mxu1 %vm351_vm3, %v601_v47  ;;  %v492_v1 = vsel %vm358_vm1, %v484_v46, 0  ;;  %v746_v4 = vsel %vm358_vm1, %v738_v48, 0  ;;  %v476_v5 = vsel %vm473_vm4, %v474_v57, %v475_v58  ;;  %v861_v6 = vrot.slane %v3312_v59, 3  ;;  %v3597_v20 = vld [vmem:[%s3456_s8 + $0x4c] ss:$0 sps:$4 sm:$0x11]  }
  0x32   : > { %3049 = vmatpush3.bf16.msra.mxu1 %v671_v45  ;;  %3032 = vmatprep.mubr.msk.bf16.mxu0 %vm351_vm3, %v2745_v9  ;;  %v839_v7 = vshll.u32 %v3560_v60, 16  ;;  %v730_v9 = vsel %vm473_vm4, %v728_v61, %v729_v62  ;;  %v1115_v10 = vrot.slane %v3313_v63, 3  ;;  %v1093_v11 = vshll.u32 %v3565_v0, 16  ;;  %v3320_v41 = vld [vmem:[%s3451_s5 + $0x4] sm:$0x1c]  }
  0x33   : > { %3234 = vmatprep.subr.msk.bf16.mxu0 %vm358_vm1, %v484_v46  ;;  %3050 = vmatprep.mubr.msk.bf16.mxu1 %vm351_vm3, %v2762_v17  ;;  %v844_v13 = vshll.u32 %v3569_v3, 16  ;;  %v1098_v14 = vshll.u32 %v3575_v8, 16  ;;  %v1091_v15 = vshrl.u32 %v3565_v0, 16  ;;  %v477_v17 = vrot.slane %v3522_v27, 1  ;;  %v3321_v42 = vld [vmem:[%s3451_s5 + $0x4] sm:$0x1c]  }
  0x34   : > { %3237 = vmatprep.subr.msk.bf16.mxu1 %vm358_vm1, %v738_v48  ;;  %v841_v12 = vrot.slane %v839_v7, 1  ;;  %v1095_v16 = vrot.slane %v1093_v11, 1  ;;  %v731_v19 = vrot.slane %v3525_v31, 1  ;;  %v869_v26 = vsel %vm358_vm1, %v861_v6, 0  ;;  %v2788_v49 = vld [vmem:[%s3456_s8 + $0x28] sm:$0xe] }
  0x35   : > { %v846_v22 = vrot.slane %v844_v13, 1  ;;  %v1100_v24 = vrot.slane %v1098_v14, 1  ;;  %v478_v25 = vsel %vm473_vm4, %v475_v58, %v477_v17  ;;  %v848_v28 = vshrl.u32 %v3569_v3, 16  ;;  %v2806_v50 = vld [vmem:[%s3456_s8 + $0x3c] sm:$0xe] }
  0x36   : > { %v1096_v23 = vor.u32 %v1095_v16, %v1091_v15  ;;  %v732_v29 = vsel %vm473_vm4, %v729_v62, %v731_v19  ;;  %v1102_v30 = vshrl.u32 %v3575_v8, 16  ;;  %v1106_v31 = vshll.u32 %v3597_v20, 16  ;;  %v2811_v53 = vld [vmem:[%s3456_s8 + $0x50] sm:$0xf]  ;;  %v3637_v55 = vld [vmem:[%s3456_s8 + $0x54] sm:$0xf] }
  0x37   : > { %v1123_v32 = vsel %vm358_vm1, %v1115_v10, 0  ;;  %v850_v36 = vor.u32 %v848_v28, %v846_v22  ;;  %v925_v44 = vsel %vm358_vm1, %v819_v34, 0  ;;  %v1179_v46 = vsel %vm358_vm1, %v1073_v37, 0  ;;  %v2829_v57 = vld [vmem:[%s3456_s8 + $0x64] sm:$0xf] }
  0x38   : > { %v1101_v35 = vsel %vm324_vm2, %v1096_v23, %v1100_v24  ;;  %v1104_v39 = vor.u32 %v1102_v30, %v1100_v24  ;;  %v1108_v40 = vrot.slane %v1106_v31, 1  ;;  %v992_v47 = vrot.slane %v3320_v41, 2  ;;  %v3641_v58 = vld [vmem:[%s3456_s8 + $0x68] sm:$0xf]  ;;  %v3324_v61 = vld [vmem:[%s3451_s5] sm:$0x38]  }
  0x39   : > { %v1246_v48 = vrot.slane %v3321_v42, 2  ;;  %v2789_v51 = vcombine.low %v2788_v49, %v3551_v54  ;;  %v2807_v52 = vcombine.low %v2806_v50, %v3555_v56  ;;  %v3646_v62 = vcombine.low %v2811_v53, %v3637_v55  ;;  %v3679_v19 = vld [vmem:[%s3456_s8 + $0x60] ss:$0 sps:$4 sm:$0x11]   ;;  %v3332_v41 = vld [vmem:[%s3451_s5 + $0x4] sm:$0x1c]  }
  0x3a   : > { %v1109_v45 = vsel %vm324_vm2, %v1104_v39, %v1108_v40  ;;  %v1237_v63 = vrot.slane %v3575_v8, 1  ;;  %v3651_v56 = vcombine.low %v2829_v57, %v3641_v58  ;;  %v1369_v7 = vrot.slane %v3324_v61, 3  ;;  %v3333_v42 = vld [vmem:[%s3451_s5 + $0x4] sm:$0x1c]   ;;  %v2824_v49 = vld [vmem:[%s3456_s8 + $0x50] sm:$0xe] }
  0x3b   : > { %v982_v59 = vrot.slane %v2789_v51, 1  ;;  %v1236_v54 = vrot.slane %v2807_v52, 1  ;;  %v2842_v50 = vld [vmem:[%s3456_s8 + $0x64] sm:$0xe]  ;;  %v2825_v51 = vcombine.low %v2824_v49, %v3637_v55  ;;  %v2847_v53 = vld [vmem:[%s3456_s8 + $0x78] sm:$0xf] }
  0x3c   : > { %3033 = vmatmul.mubr.msk.bf16.vlgmr.msra.gmra.mrb[0].mxu0 %vm351_vm3, %v3493_v2  ;;  %v837_v2 = vshrl.u32 %v3560_v60, 16  ;;  %v1599_v15 = vshrl.u32 %v3651_v56, 16  ;;  %v1377_v30 = vsel %vm358_vm1, %v1369_v7, 0  ;;  %v2843_v52 = vcombine.low %v2842_v50, %v3641_v58  ;;  %v3723_v57 = vld [vmem:[%s3456_s8 + $0x7c] sm:$0xf] }
  0x3d   : > { %3037 = vmatpush3.bf16.msra.mxu0 %v492_v1  ;;  %3051 = vmatmul.mubr.msk.bf16.vlgmr.msra.gmra.mrb[0].mxu1 %vm351_vm3, %v3514_v18  ;;  %v3593_v18 = vld [vmem:[%s3456_s8 + $0x38] ss:$0 sps:$4 sm:$0x11]   ;;  %v1000_v1 = vsel %vm358_vm1, %v992_v47, 0  ;;  %v1490_v61 = vrot.slane %v2825_v51, 1  ;;  %vm555_vm5 = vcmask 130048  }
  0x3e   : > { %3055 = vmatpush3.bf16.msra.mxu1 %v746_v4  ;;  %3038 = vmatprep.mubr.msk.bf16.mxu0 %vm351_vm3, %v476_v5  ;;  %v842_v21 = vor.u32 %v841_v12, %v837_v2  ;;  %v852_v27 = vshll.u32 %v3593_v18, 16  ;;  %v1254_v4 = vsel %vm358_vm1, %v1246_v48, 0  ;;  %v3656_v5 = vld [vmem:[%s3456_s8 + $0x58] sm:$0xff]   ;;  %v3664_v2 = vld [vmem:[%s3456_s8 + $0x6c] sm:$0xff]   ;;  %v1601_v12 = vshll.u32 %v3651_v56, 16 }
  0x3f   : > { %3056 = vmatprep.mubr.msk.bf16.mxu1 %vm351_vm3, %v730_v9  ;;  %3238 = vmatprep.subr.msk.bf16.mxu0 %vm358_vm1, %v861_v6  ;;  %v1347_v9 = vshll.u32 %v3646_v62, 16  ;;  %v1352_v14 = vshll.u32 %v3656_v5, 16  ;;  %v1606_v17 = vshll.u32 %v3664_v2, 16  ;;  %v1744_v55 = vrot.slane %v2843_v52, 1  ;;  %v2860_v49 = vld [vmem:[%s3456_s8 + $0x78] sm:$0xe] }
  0x40   : > { %3241 = vmatprep.subr.msk.bf16.mxu1 %vm358_vm1, %v1115_v10  ;;  %v847_v33 = vsel %vm324_vm2, %v842_v21, %v846_v22  ;;  %v854_v38 = vrot.slane %v852_v27, 1  ;;  %v1238_v10 = vsel %vm473_vm4, %v1236_v54, %v1237_v63  ;;  %v1603_v16 = vrot.slane %v1601_v12, 1  ;;  %v3683_v22 = vld [vmem:[%s3456_s8 + $0x74] ss:$0 sps:$4 sm:$0x11]  }
  0x41   : > { %v1349_v13 = vrot.slane %v1347_v9, 1  ;;  %v1239_v21 = vrot.slane %v3597_v20, 1  ;;  %v1354_v24 = vrot.slane %v1352_v14, 1  ;;  %v1356_v27 = vshrl.u32 %v3656_v5, 16  ;;  %v3336_v54 = vld [vmem:[%s3451_s5] sm:$0x38]  }
  0x42   : > { %v855_v43 = vsel %vm324_vm2, %v850_v36, %v854_v38  ;;  %v1610_v20 = vshrl.u32 %v3664_v2, 16  ;;  %v1614_v31 = vshll.u32 %v3683_v22, 16  ;;  %v3743_v9 = vld [vmem:[%s3456_s8 + $0x80] sm:$0xff]   ;;  %v2878_v50 = vld [vmem:[%s3456_s8 + $0x8c] sm:$0xe]  ;;  %v2861_v51 = vcombine.low %v2860_v49, %v3723_v57  ;;  %v1566_v49 = vld [vmem:[#allocation2 + $0x90] sm:$0xff] }
  0x43   : > { %v1358_v36 = vor.u32 %v1356_v27, %v1354_v24  ;;  %vm2573_vm6 = vcmask (!%p2883_p8), 125952  }
  0x44   : > { %v1616_v40 = vrot.slane %v1614_v31, 1 }
  0x48   : > { %3039 = vmatmul.mubr.msk.bf16.vlgmr.msra.gmra.mrb[0].mxu0 %vm351_vm3, %v478_v25  ;;  %v1604_v25 = vor.u32 %v1603_v16, %v1599_v15  ;;  %v1860_v15 = vshll.u32 %v3743_v9, 16 }
  0x49   : > { %3057 = vmatmul.mubr.msk.bf16.vlgmr.msra.gmra.mrb[0].mxu1 %vm351_vm3, %v732_v29  ;;  %3061 = vmatpush3.bf16.msra.mxu0 %v869_v26  ;;  %v1608_v26 = vrot.slane %v1606_v17, 1  ;;  %v1360_v29 = vshll.u32 %v3679_v19, 16 }
  0x4a   : > { %3079 = vmatpush3.bf16.msra.mxu1 %v1123_v32  ;;  %3062 = vmatprep.mubr.msk.bf16.mxu0 %vm351_vm3, %v847_v33 }
  0x4b   : > { %3239 = vmatprep.subr.msk.bf16.mxu0 %vm358_vm1, %v819_v34  ;;  %3080 = vmatprep.mubr.msk.bf16.mxu1 %vm351_vm3, %v1101_v35  ;;  %v1327_v34 = vld [vmem:[%s3451_s5] sm:$0x7]  ;;  %v1609_v35 = vsel %vm324_vm2, %v1604_v25, %v1608_v26  ;;  %v1362_v38 = vrot.slane %v1360_v29, 1  ;;  %v1612_v39 = vor.u32 %v1610_v20, %v1608_v26  ;;  %v1862_v26 = vrot.slane %v1860_v15, 1 }
  0x4c   : > { %3242 = vmatprep.subr.msk.bf16.mxu1 %vm358_vm1, %v1073_v37  ;;  %v1581_v37 = vld [vmem:[%s3451_s5] sm:$0x7] }
  0x50   : > { %3063 = vmatmul.mubr.msk.bf16.vlgmr.msra.gmra.mrb[4].mxu0 %vm351_vm3, %v855_v43  ;;  %v1363_v43 = vsel %vm324_vm2, %v1358_v36, %v1362_v38 }
  0x51   : > { %3067 = vmatpush3.bf16.msra.mxu0 %v925_v44  ;;  %3081 = vmatmul.mubr.msk.bf16.vlgmr.msra.gmra.mrb[4].mxu1 %vm351_vm3, %v1109_v45  ;;  %v1433_v44 = vsel %vm358_vm1, %v1327_v34, 0  ;;  %v1617_v45 = vsel %vm324_vm2, %v1612_v39, %v1616_v40 }
  0x52   : > { %3085 = vmatpush3.bf16.msra.mxu1 %v1179_v46  ;;  %3068 = vmatprep.mubr.msk.bf16.mxu0 %vm351_vm3, %v3560_v60  ;;  %v983_v60 = vrot.slane %v3569_v3, 1  ;;  %v1687_v46 = vsel %vm358_vm1, %v1581_v37, 0 }
  0x53   : > { %3240 = vmatprep.subr.msk.bf16.mxu0 %vm358_vm1, %v992_v47  ;;  %3086 = vmatprep.mubr.msk.bf16.mxu1 %vm351_vm3, %v3565_v0  ;;  %v3325_v0 = vld [vmem:[%s3451_s5] sm:$0x38]   ;;  %v1500_v47 = vrot.slane %v3332_v41, 2  ;;  %v3344_v41 = vld [vmem:[%s3451_s5 + $0x4] sm:$0x1c]  }
  0x54   : > { %3243 = vmatprep.subr.msk.bf16.mxu1 %vm358_vm1, %v1246_v48  ;;  %v984_v6 = vsel %vm473_vm4, %v982_v59, %v983_v60  ;;  %v1623_v11 = vrot.slane %v3325_v0, 3  ;;  %v1754_v48 = vrot.slane %v3333_v42, 2  ;;  %v2865_v59 = vld [vmem:[%s3456_s8 + $0x8c] sm:$0xf]  ;;  %v1745_v0 = vrot.slane %v3664_v2, 1 }
  0x55   : > { %v3345_v42 = vld [vmem:[%s3451_s5 + $0x4] sm:$0x1c]  }
  0x56   : > { %v1631_v32 = vsel %vm358_vm1, %v1623_v11, 0 }
  0x5c   : > { %3069 = vmatmul.mubr.msk.bf16.vlgmr.msra.gmra.mrb[4].mxu0 %vm351_vm3, %v3569_v3  ;;  %v1345_v3 = vshrl.u32 %v3646_v62, 16 }
  0x5d   : > { %3073 = vmatpush3.bf16.msra.mxu0 %v1000_v1  ;;  %3087 = vmatmul.mubr.msk.bf16.vlgmr.msra.gmra.mrb[4].mxu1 %vm351_vm3, %v3575_v8  ;;  %v985_v8 = vrot.slane %v3593_v18, 1  ;;  %v1240_v18 = vsel %vm473_vm4, %v1237_v63, %v1239_v21  ;;  %v3732_v63 = vcombine.low %v2847_v53, %v3723_v57  ;;  %v1508_v1 = vsel %vm358_vm1, %v1500_v47, 0  ;;  %v3765_v21 = vld [vmem:[%s3456_s8 + $0x88] ss:$0 sps:$4 sm:$0x11]  }
  0x5e   : > { %3091 = vmatpush3.bf16.msra.mxu1 %v1254_v4  ;;  %3074 = vmatprep.mubr.msk.bf16.mxu0 %vm351_vm3, %v984_v6  ;;  %v1350_v23 = vor.u32 %v1349_v13, %v1345_v3  ;;  %v1762_v4 = vsel %vm358_vm1, %v1754_v48, 0  ;;  %v3750_v3 = vld [vmem:[%s3456_s8 + $0x94] sm:$0xff]   ;;  %v1998_v53 = vrot.slane %v2861_v51, 1  ;;  %v1564_v51 = vld [vmem:[#allocation2 + $0x80] sm:$0xff] }
  0x5f   : > { %3092 = vmatprep.mubr.msk.bf16.mxu1 %vm351_vm3, %v1238_v10  ;;  %3244 = vmatprep.subr.msk.bf16.mxu0 %vm358_vm1, %v1369_v7  ;;  %v986_v28 = vsel %vm473_vm4, %v983_v60, %v985_v8  ;;  %v3727_v60 = vld [vmem:[%s3456_s8 + $0x90] sm:$0xf]  ;;  %v1877_v7 = vrot.slane %v3336_v54, 3  ;;  %v1855_v10 = vshll.u32 %v3732_v63, 16  ;;  %v2114_v8 = vshll.u32 %v3750_v3, 16 }
  0x60   : > { %3247 = vmatprep.subr.msk.bf16.mxu1 %vm358_vm1, %v1623_v11  ;;  %v1355_v33 = vsel %vm324_vm2, %v1350_v23, %v1354_v24  ;;  %v3737_v58 = vcombine.low %v2865_v59, %v3727_v60  ;;  %v1746_v11 = vsel %vm473_vm4, %v1744_v55, %v1745_v0  ;;  %v1747_v23 = vrot.slane %v3683_v22, 1  ;;  %v3769_v24 = vld [vmem:[%s3456_s8 + $0x9c] ss:$0 sps:$4 sm:$0x11]  }
  0x61   : > { %v1857_v14 = vrot.slane %v1855_v10, 1  ;;  %v2116_v27 = vrot.slane %v2114_v8, 1  ;;  %v1885_v20 = vsel %vm358_vm1, %v1877_v7, 0  ;;  %v2118_v22 = vshrl.u32 %v3750_v3, 16  ;;  %v550_v10 = vld [vmem:[#allocation2 + $0x18] sm:$0xff]  ;;  %v803_v8 = vld [vmem:[#allocation2 + $0x28] sm:$0xff] }
  0x62   : > { %v2109_v13 = vshll.u32 %v3737_v58, 16  ;;  %v2107_v16 = vshrl.u32 %v3737_v58, 16  ;;  %v2122_v31 = vshll.u32 %v3769_v24, 16  ;;  %v2879_v52 = vcombine.low %v2878_v50, %v3727_v60  ;;  %v1820_v50 = vld [vmem:[#allocation2 + $0xb0] sm:$0xff] }
  0x63   : > { %v2120_v39 = vor.u32 %v2118_v22, %v2116_v27  ;;  %v1999_v59 = vrot.slane %v3743_v9, 1  ;;  %v2001_v60 = vrot.slane %v3765_v21, 1  ;;  %v1059_v22 = vld [vmem:[#allocation2 + $0x58] sm:$0xff] }
  0x64   : > { %v2111_v17 = vrot.slane %v2109_v13, 1  ;;  %v2124_v40 = vrot.slane %v2122_v31, 1  ;;  %v805_v13 = vld [vmem:[#allocation2 + $0x38] sm:$0xff] }
  0x65   : > { %v2000_v55 = vsel %vm473_vm4, %v1998_v53, %v1999_v59  ;;  %v1818_v53 = vld [vmem:[#allocation2 + $0xa0] sm:$0xff] }
  0x68   : > { %3075 = vmatmul.mubr.msk.bf16.vlgmr.msra.gmra.mrb[4].mxu0 %vm351_vm3, %v986_v28  ;;  %v2112_v28 = vor.u32 %v2111_v17, %v2107_v16 }
  0x69   : > { %3093 = vmatmul.mubr.msk.bf16.vlgmr.msra.gmra.mrb[4].mxu1 %vm351_vm3, %v1240_v18  ;;  %3097 = vmatpush3.bf16.msra.mxu0 %v1377_v30  ;;  %v1864_v18 = vshrl.u32 %v3743_v9, 16  ;;  %v1868_v30 = vshll.u32 %v3765_v21, 16 }
  0x6a   : > { %3115 = vmatpush3.bf16.msra.mxu1 %v1631_v32  ;;  %3098 = vmatprep.mubr.msk.bf16.mxu0 %vm351_vm3, %v1355_v33 }
  0x6b   : > { %3245 = vmatprep.subr.msk.bf16.mxu0 %vm358_vm1, %v1327_v34  ;;  %3116 = vmatprep.mubr.msk.bf16.mxu1 %vm351_vm3, %v1609_v35  ;;  %v1835_v34 = vld [vmem:[%s3451_s5] sm:$0x7]  ;;  %v2117_v35 = vsel %vm324_vm2, %v2112_v28, %v2116_v27  ;;  %v1866_v36 = vor.u32 %v1864_v18, %v1862_v26  ;;  %v1870_v38 = vrot.slane %v1868_v30, 1  ;;  %v1312_v18 = vld [vmem:[#allocation2 + $0x70] sm:$0xff] }
  0x6c   : > { %3248 = vmatprep.subr.msk.bf16.mxu1 %vm358_vm1, %v1581_v37  ;;  %v2089_v37 = vld [vmem:[%s3451_s5] sm:$0x7] }
  0x6d   : > { %v1056_v30 = vld [vmem:[#allocation2 + $0x40] sm:$0xff] }
  0x70   : > { %3099 = vmatmul.mubr.msk.bf16.vlgmr.msra.gmra.mrb[8].mxu0 %vm351_vm3, %v1363_v43  ;;  %v1871_v43 = vsel %vm324_vm2, %v1866_v36, %v1870_v38 }
  0x71   : > { %3103 = vmatpush3.bf16.msra.mxu0 %v1433_v44  ;;  %3117 = vmatmul.mubr.msk.bf16.vlgmr.msra.gmra.mrb[8].mxu1 %vm351_vm3, %v1617_v45  ;;  %v1941_v44 = vsel %vm358_vm1, %v1835_v34, 0  ;;  %v2125_v45 = vsel %vm324_vm2, %v2120_v39, %v2124_v40  ;;  %v1311_v40 = vld [vmem:[#allocation2 + $0x68] sm:$0xff] }
  0x72   : > { %3121 = vmatpush3.bf16.msra.mxu1 %v1687_v46  ;;  %3104 = vmatprep.mubr.msk.bf16.mxu0 %vm351_vm3, %v3646_v62  ;;  %v1491_v62 = vrot.slane %v3656_v5, 1  ;;  %v2195_v46 = vsel %vm358_vm1, %v2089_v37, 0 }
  0x73   : > { %3246 = vmatprep.subr.msk.bf16.mxu0 %vm358_vm1, %v1500_v47  ;;  %3122 = vmatprep.mubr.msk.bf16.mxu1 %vm351_vm3, %v3651_v56  ;;  %v3337_v56 = vld [vmem:[%s3451_s5] sm:$0x38]   ;;  %v2008_v47 = vrot.slane %v3344_v41, 2 }
  0x74   : > { %3249 = vmatprep.subr.msk.bf16.mxu1 %vm358_vm1, %v1754_v48  ;;  %v1492_v6 = vsel %vm473_vm4, %v1490_v61, %v1491_v62  ;;  %v2131_v12 = vrot.slane %v3337_v56, 3  ;;  %v2262_v48 = vrot.slane %v3345_v42, 2  ;;  %v2252_v61 = vrot.slane %v2879_v52, 1 }
  0x75   : > { %v2016_v54 = vsel %vm358_vm1, %v2008_v47, 0  ;;  %v2002_v56 = vsel %vm473_vm4, %v1999_v59, %v2001_v60  ;;  %v1567_v59 = vld [vmem:[#allocation2 + $0x98] sm:$0xff] }
  0x76   : > { %v2139_v32 = vsel %vm358_vm1, %v2131_v12, 0 }
  0x7c   : > { %3105 = vmatmul.mubr.msk.bf16.vlgmr.msra.gmra.mrb[8].mxu0 %vm351_vm3, %v3656_v5  ;;  %v1853_v5 = vshrl.u32 %v3732_v63, 16 }
  0x7d   : > { %3109 = vmatpush3.bf16.msra.mxu0 %v1508_v1  ;;  %3123 = vmatmul.mubr.msk.bf16.vlgmr.msra.gmra.mrb[8].mxu1 %vm351_vm3, %v3664_v2  ;;  %v1493_v2 = vrot.slane %v3679_v19, 1  ;;  %v1748_v19 = vsel %vm473_vm4, %v1745_v0, %v1747_v23  ;;  %v2255_v0 = vrot.slane %v3769_v24, 1  ;;  %v549_v1 = vld [vmem:[#allocation2 + $0x10] sm:$0xff] }
  0x7e   : > { %3127 = vmatpush3.bf16.msra.mxu1 %v1762_v4  ;;  %3110 = vmatprep.mubr.msk.bf16.mxu0 %vm351_vm3, %v1492_v6  ;;  %v1858_v25 = vor.u32 %v1857_v14, %v1853_v5  ;;  %v804_v4 = vld [vmem:[#allocation2 + $0x30] sm:$0xff]  ;;  %v547_v6 = vld [vmem:[#allocation2] sm:$0xff]  ;;  %v548_v5 = vld [vmem:[#allocation2 + $0x8] sm:$0xff] }
  0x7f   : > { %3128 = vmatprep.mubr.msk.bf16.mxu1 %vm351_vm3, %v1746_v11  ;;  %3250 = vmatprep.subr.msk.bf16.mxu0 %vm358_vm1, %v1877_v7  ;;  %v1494_v29 = vsel %vm473_vm4, %v1491_v62, %v1493_v2  ;;  %v2253_v62 = vrot.slane %v3750_v3, 1 }
  0x80   : > { %3253 = vmatprep.subr.msk.bf16.mxu1 %vm358_vm1, %v2131_v12  ;;  %v1863_v33 = vsel %vm324_vm2, %v1858_v25, %v1862_v26 }
  0x81   : > { %v2254_v57 = vsel %vm473_vm4, %v2252_v61, %v2253_v62 }
  0x88   : > { %3111 = vmatmul.mubr.msk.bf16.vlgmr.msra.gmra.mrb[8].mxu0 %vm351_vm3, %v1494_v29  ;;  %v1058_v29 = vld [vmem:[#allocation2 + $0x50] sm:$0xff] }
  0x89   : > { %3129 = vmatmul.mubr.msk.bf16.vlgmr.msra.gmra.mrb[8].mxu1 %vm351_vm3, %v1748_v19  ;;  %3133 = vmatpush3.bf16.msra.mxu0 %v1885_v20  ;;  %v1310_v20 = vld [vmem:[#allocation2 + $0x60] sm:$0xff] }
  0x8a   : > { %3151 = vmatpush3.bf16.msra.mxu1 %v2139_v32  ;;  %3134 = vmatprep.mubr.msk.bf16.mxu0 %vm351_vm3, %v1863_v33 }
  0x8b   : > { %3251 = vmatprep.subr.msk.bf16.mxu0 %vm358_vm1, %v1835_v34  ;;  %3152 = vmatprep.mubr.msk.bf16.mxu1 %vm351_vm3, %v2117_v35  ;;  %v1313_v34 = vld [vmem:[#allocation2 + $0x78] sm:$0xff]  ;;  %v1057_v35 = vld [vmem:[#allocation2 + $0x48] sm:$0xff] }
  0x8c   : > { %3254 = vmatprep.subr.msk.bf16.mxu1 %vm358_vm1, %v2089_v37 }
  0x90   : > { %3135 = vmatmul.mubr.msk.bf16.vlgmr.msra.gmra.mrb[12].mxu0 %vm351_vm3, %v1871_v43 }
  0x91   : > { %3139 = vmatpush3.bf16.msra.mxu0 %v1941_v44  ;;  %3153 = vmatmul.mubr.msk.bf16.vlgmr.msra.gmra.mrb[12].mxu1 %vm351_vm3, %v2125_v45 }
  0x92   : > { %3157 = vmatpush3.bf16.msra.mxu1 %v2195_v46  ;;  %3140 = vmatprep.mubr.msk.bf16.mxu0 %vm351_vm3, %v3732_v63  ;;  %v2270_v63 = vsel %vm358_vm1, %v2262_v48, 0 }
  0x93   : > { %3252 = vmatprep.subr.msk.bf16.mxu0 %vm358_vm1, %v2008_v47  ;;  %3158 = vmatprep.mubr.msk.bf16.mxu1 %vm351_vm3, %v3737_v58  ;;  %v2256_v58 = vsel %vm473_vm4, %v2253_v62, %v2255_v0 }
  0x94   : > { %3255 = vmatprep.subr.msk.bf16.mxu1 %vm358_vm1, %v2262_v48 }
  0x9c   : > { %3141 = vmatmul.mubr.msk.bf16.vlgmr.msra.gmra.mrb[12].mxu0 %vm351_vm3, %v3743_v9  ;;  %v802_v9 = vld [vmem:[#allocation2 + $0x20] sm:$0xff] }
  0x9d   : > { %3145 = vmatpush3.bf16.msra.mxu0 %v2016_v54  ;;  %3159 = vmatmul.mubr.msk.bf16.vlgmr.msra.gmra.mrb[12].mxu1 %vm351_vm3, %v3750_v3 }
  0x9e   : > { %3163 = vmatpush3.bf16.msra.mxu1 %v2270_v63  ;;  %3146 = vmatprep.mubr.msk.bf16.mxu0 %vm351_vm3, %v2000_v55  ;;  %v1821_v63 = vld [vmem:[#allocation2 + $0xb8] sm:$0xff]  ;;  %v1565_v55 = vld [vmem:[#allocation2 + $0x88] sm:$0xff] }
  0x9f   : > { %3164 = vmatprep.mubr.msk.bf16.mxu1 %vm351_vm3, %v2254_v57 }
  0xa8   : > { %3147 = vmatmul.mubr.msk.bf16.vlgmr.msra.gmra.mrb[12].mxu0 %vm351_vm3, %v2002_v56 }
  0xa9   : > { %3165 = vmatmul.mubr.msk.bf16.vlgmr.msra.gmra.mrb[12].mxu1 %vm351_vm3, %v2256_v58  ;;  %v1819_v58 = vld [vmem:[#allocation2 + $0xa8] sm:$0xff] }
 0x11b   : > { %v3040_v7 = vpop.f32.mrb[0].mxu0 }
 0x11c   : > { %v553_v11 = vadd.f32 %v3040_v7, %v549_v1  ;;  %v3058_v12 = vpop.f32.mrb[0].mxu1  ;;  %v528_v3 = vpop.f32.mrb[1].mxu0 }
 0x11d   : > { %v808_v14 = vadd.f32 %v3058_v12, %v804_v4  ;;  %v551_v15 = vadd.f32 %v547_v6, %v528_v3  ;;  %v782_v16 = vpop.f32.mrb[1].mxu1  ;;  %v3041_v17 = vpop.f32.mrb[2].mxu0  ;;  %v2074_v3 = vld [vmem:[#allocation2 + $0xd0] sm:$0xff] }
 0x11e   : > { %558 = vst.msk [vmem:[#allocation2 + $0x10] sm:$0xff] %vm555_vm5, %v553_v11  ;;  %v806_v2 = vadd.f32 %v802_v9, %v782_v16  ;;  %v554_v21 = vadd.f32 %v3041_v17, %v550_v10  ;;  %v3059_v23 = vpop.f32.mrb[2].mxu1  ;;  %v531_v24 = vpop.f32.mrb[3].mxu0  ;;  %v2075_v16 = vld [vmem:[#allocation2 + $0xd8] sm:$0xff] }
 0x11f   : > { %812 = vst.msk [vmem:[#allocation2 + $0x30] sm:$0xff] %vm555_vm5, %v808_v14  ;;  %556 = vst.msk [vmem:[#allocation2] sm:$0xff] %vm555_vm5, %v551_v15  ;;  %v809_v25 = vadd.f32 %v3059_v23, %v805_v13  ;;  %v552_v26 = vadd.f32 %v548_v5, %v531_v24  ;;  %v785_v28 = vpop.f32.mrb[3].mxu1  ;;  %v2328_v13 = vld [vmem:[#allocation2 + $0xf0] sm:$0xff]  ;;  %v2072_v5 = vld [vmem:[#allocation2 + $0xc0] sm:$0xff] }
 0x120   : > { %810 = vst.msk [vmem:[#allocation2 + $0x20] sm:$0xff] %vm555_vm5, %v806_v2  ;;  %559 = vst.msk [vmem:[#allocation2 + $0x18] sm:$0xff] %vm555_vm5, %v554_v21  ;;  %v807_v27 = vadd.f32 %v803_v8, %v785_v28  ;;  %v2326_v15 = vld [vmem:[#allocation2 + $0xe0] sm:$0xff]  ;;  %v2329_v21 = vld [vmem:[#allocation2 + $0xf8] sm:$0xff] }
 0x121   : > { %813 = vst.msk [vmem:[#allocation2 + $0x38] sm:$0xff] %vm555_vm5, %v809_v25  ;;  %557 = vst.msk [vmem:[#allocation2 + $0x8] sm:$0xff] %vm555_vm5, %v552_v26  ;;  %v2073_v23 = vld [vmem:[#allocation2 + $0xc8] sm:$0xff] }
 0x122   : > { %811 = vst.msk [vmem:[#allocation2 + $0x28] sm:$0xff] %vm555_vm5, %v807_v27  ;;  %v2327_v27 = vld [vmem:[#allocation2 + $0xe8] sm:$0xff] }
 0x13b   : > { %v3076_v19 = vpop.f32.mrb[4].mxu0 }
 0x13c   : > { %v1062_v31 = vadd.f32 %v3076_v19, %v1058_v29  ;;  %v3094_v32 = vpop.f32.mrb[4].mxu1  ;;  %v1036_v33 = vpop.f32.mrb[5].mxu0 }
 0x13d   : > { %v1316_v36 = vadd.f32 %v3094_v32, %v1312_v18  ;;  %v1060_v37 = vadd.f32 %v1056_v30, %v1036_v33  ;;  %v1290_v38 = vpop.f32.mrb[5].mxu1  ;;  %v3077_v39 = vpop.f32.mrb[6].mxu0  ;;  %v2342_v33 = vld [vmem:[#allocation2] sm:$0xff] (!%p2883_p8) }
 0x13e   : > { %1066 = vst.msk [vmem:[#allocation2 + $0x50] sm:$0xff] %vm555_vm5, %v1062_v31  ;;  %v1314_v41 = vadd.f32 %v1310_v20, %v1290_v38  ;;  %v1063_v42 = vadd.f32 %v3077_v39, %v1059_v22  ;;  %v3095_v43 = vpop.f32.mrb[6].mxu1  ;;  %v1039_v44 = vpop.f32.mrb[7].mxu0  ;;  %v2344_v38 = vld [vmem:[#allocation2 + $0x10] sm:$0xff] (!%p2883_p8)  ;;  %v2345_v39 = vld [vmem:[#allocation2 + $0x18] sm:$0xff] (!%p2883_p8) }
 0x13f   : > { %1320 = vst.msk [vmem:[#allocation2 + $0x70] sm:$0xff] %vm555_vm5, %v1316_v36  ;;  %1064 = vst.msk [vmem:[#allocation2 + $0x40] sm:$0xff] %vm555_vm5, %v1060_v37  ;;  %v1317_v45 = vadd.f32 %v3095_v43, %v1313_v34  ;;  %v1061_v46 = vadd.f32 %v1057_v35, %v1039_v44  ;;  %v1293_v47 = vpop.f32.mrb[7].mxu1  ;;  %v3861_v34 = vld [vmem:[%s3976_s2] ss:$0 sm:$0xff] (!%p2883_p8)  ;;  %v2343_v35 = vld [vmem:[#allocation2 + $0x8] sm:$0xff] (!%p2883_p8) }
 0x140   : > { %1318 = vst.msk [vmem:[#allocation2 + $0x60] sm:$0xff] %vm555_vm5, %v1314_v41  ;;  %1067 = vst.msk [vmem:[#allocation2 + $0x58] sm:$0xff] %vm555_vm5, %v1063_v42  ;;  %v1315_v48 = vadd.f32 %v1311_v40, %v1293_v47  ;;  %v2381_v36 = vadd.f32 (!%p2883_p8), %v3861_v34, %v2342_v33  ;;  %v2382_v37 = vadd.f32 (!%p2883_p8), %v3861_v34, %v2343_v35  ;;  %v2346_v40 = vld [vmem:[#allocation2 + $0x20] sm:$0xff] (!%p2883_p8)  ;;  %v2347_v44 = vld [vmem:[#allocation2 + $0x28] sm:$0xff] (!%p2883_p8) }
 0x141   : > { %1321 = vst.msk [vmem:[#allocation2 + $0x78] sm:$0xff] %vm555_vm5, %v1317_v45  ;;  %1065 = vst.msk [vmem:[#allocation2 + $0x48] sm:$0xff] %vm555_vm5, %v1061_v46  ;;  %v2383_v41 = vadd.f32 (!%p2883_p8), %v3861_v34, %v2344_v38  ;;  %v2384_v42 = vadd.f32 (!%p2883_p8), %v3861_v34, %v2345_v39  ;;  %v2385_v43 = vadd.f32 (!%p2883_p8), %v3861_v34, %v2346_v40  ;;  %v2348_v45 = vld [vmem:[#allocation2 + $0x30] sm:$0xff] (!%p2883_p8)  ;;  %v2349_v46 = vld [vmem:[#allocation2 + $0x38] sm:$0xff] (!%p2883_p8) }
 0x142   : > { %1319 = vst.msk [vmem:[#allocation2 + $0x68] sm:$0xff] %vm555_vm5, %v1315_v48  ;;  %v2413_v47 = vmax.f32 (!%p2883_p8), %v2381_v36, 0.0  ;;  %v2414_v48 = vmax.f32 (!%p2883_p8), %v2382_v37, 0.0 }
 0x15b   : > { %v3112_v52 = vpop.f32.mrb[8].mxu0 }
 0x15c   : > { %v1570_v61 = vadd.f32 %v3112_v52, %v1566_v49  ;;  %v3130_v62 = vpop.f32.mrb[8].mxu1  ;;  %v1544_v54 = vpop.f32.mrb[9].mxu0  ;;  %v2386_v49 = vadd.f32 (!%p2883_p8), %v3861_v34, %v2347_v44  ;;  %v2416_v52 = vmax.f32 (!%p2883_p8), %v2384_v42, 0.0 }
 0x15d   : > { %v1824_v57 = vadd.f32 %v3130_v62, %v1820_v50  ;;  %v1568_v60 = vadd.f32 %v1564_v51, %v1544_v54  ;;  %v1798_v0 = vpop.f32.mrb[9].mxu1  ;;  %v3113_v56 = vpop.f32.mrb[10].mxu0  ;;  %v2387_v50 = vadd.f32 (!%p2883_p8), %v3861_v34, %v2348_v45  ;;  %v2415_v51 = vmax.f32 (!%p2883_p8), %v2383_v41, 0.0  ;;  %v2351_v62 = vld [vmem:[#allocation2 + $0x48] sm:$0xff] (!%p2883_p8) }
 0x15e   : > { %1574 = vst.msk [vmem:[#allocation2 + $0x90] sm:$0xff] %vm555_vm5, %v1570_v61  ;;  %v1822_v1 = vadd.f32 %v1818_v53, %v1798_v0  ;;  %v1571_v4 = vadd.f32 %v3113_v56, %v1567_v59  ;;  %v3131_v6 = vpop.f32.mrb[10].mxu1  ;;  %v1547_v7 = vpop.f32.mrb[11].mxu0  ;;  %v2417_v53 = vmax.f32 (!%p2883_p8), %v2385_v43, 0.0  ;;  %v2388_v59 = vadd.f32 (!%p2883_p8), %v3861_v34, %v2349_v46  ;;  %v2350_v61 = vld [vmem:[#allocation2 + $0x40] sm:$0xff] (!%p2883_p8)  ;;  %v2353_v0 = vld [vmem:[#allocation2 + $0x58] sm:$0xff] (!%p2883_p8) }
 0x15f   : > { %1828 = vst.msk [vmem:[#allocation2 + $0xb0] sm:$0xff] %vm555_vm5, %v1824_v57  ;;  %1572 = vst.msk [vmem:[#allocation2 + $0x80] sm:$0xff] %vm555_vm5, %v1568_v60  ;;  %v1825_v9 = vadd.f32 %v3131_v6, %v1821_v63  ;;  %v1569_v10 = vadd.f32 %v1565_v55, %v1547_v7  ;;  %v1801_v11 = vpop.f32.mrb[11].mxu1  ;;  %v2920_v54 = vpack.c.bf16 (!%p2883_p8), %v2413_v47, %v2413_v47  ;;  %v2418_v55 = vmax.f32 (!%p2883_p8), %v2386_v49, 0.0  ;;  %v2352_v60 = vld [vmem:[#allocation2 + $0x50] sm:$0xff] (!%p2883_p8)  ;;  %v2354_v56 = vld [vmem:[#allocation2 + $0x60] sm:$0xff] (!%p2883_p8) }
 0x160   : > { %1826 = vst.msk [vmem:[#allocation2 + $0xa0] sm:$0xff] %vm555_vm5, %v1822_v1  ;;  %1575 = vst.msk [vmem:[#allocation2 + $0x98] sm:$0xff] %vm555_vm5, %v1571_v4  ;;  %v1823_v12 = vadd.f32 %v1819_v58, %v1801_v11  ;;  %v2921_v63 = vpack.c.bf16 (!%p2883_p8), %v2414_v48, %v2414_v48  ;;  %v2419_v57 = vmax.f32 (!%p2883_p8), %v2387_v50, 0.0  ;;  %v2922_v58 = vpack.c.bf16 (!%p2883_p8), %v2415_v51, %v2415_v51  ;;  %v2355_v7 = vld [vmem:[#allocation2 + $0x68] sm:$0xff] (!%p2883_p8) }
 0x161   : > { %1829 = vst.msk [vmem:[#allocation2 + $0xb8] sm:$0xff] %vm555_vm5, %v1825_v9  ;;  %1573 = vst.msk [vmem:[#allocation2 + $0x88] sm:$0xff] %vm555_vm5, %v1569_v10  ;;  %v2923_v1 = vpack.c.bf16 (!%p2883_p8), %v2416_v52, %v2416_v52  ;;  %v2924_v4 = vpack.c.bf16 (!%p2883_p8), %v2417_v53, %v2417_v53  ;;  %v2420_v6 = vmax.f32 (!%p2883_p8), %v2388_v59, 0.0  ;;  %v2356_v9 = vld [vmem:[#allocation2 + $0x70] sm:$0xff] (!%p2883_p8)  ;;  %v2925_v10 = vpack.c.bf16 (!%p2883_p8), %v2418_v55, %v2418_v55 }
 0x162   : > { %1827 = vst.msk [vmem:[#allocation2 + $0xa8] sm:$0xff] %vm555_vm5, %v1823_v12  ;;  %v2926_v11 = vpack.c.bf16 (!%p2883_p8), %v2419_v57, %v2419_v57  ;;  %v2389_v12 = vadd.f32 (!%p2883_p8), %v3861_v34, %v2350_v61 }
 0x163   : > { %2574 = vst.msk [vmem:[%s3446_s27] sm:$0xf] (!%p2883_p8), %vm2573_vm6, %v2920_v54  ;;  %2575 = vst.msk [vmem:[%s3446_s27 + $0x4] sm:$0xf] (!%p2883_p8), %vm2573_vm6, %v2921_v63 }
 0x164   : > { %2576 = vst.msk [vmem:[%s3446_s27 + $0x8] sm:$0xf] (!%p2883_p8), %vm2573_vm6, %v2922_v58  ;;  %2577 = vst.msk [vmem:[%s3446_s27 + $0xc] sm:$0xf] (!%p2883_p8), %vm2573_vm6, %v2923_v1 }
 0x165   : > { %2578 = vst.msk [vmem:[%s3446_s27 + $0x10] sm:$0xf] (!%p2883_p8), %vm2573_vm6, %v2924_v4  ;;  %2579 = vst.msk [vmem:[%s3446_s27 + $0x14] sm:$0xf] (!%p2883_p8), %vm2573_vm6, %v2925_v10 }
 0x166   : > { %2580 = vst.msk [vmem:[%s3446_s27 + $0x18] sm:$0xf] (!%p2883_p8), %vm2573_vm6, %v2926_v11  ;;  %v2364_v38 = vld [vmem:[#allocation2 + $0xb0] sm:$0xff] (!%p2883_p8) }
 0x167   : > { %v2403_v51 = vadd.f32 (!%p2883_p8), %v3861_v34, %v2364_v38 }
 0x168   : > { %v2365_v43 = vld [vmem:[#allocation2 + $0xb8] sm:$0xff] (!%p2883_p8) }
 0x169   : > { %v2363_v37 = vld [vmem:[#allocation2 + $0xa8] sm:$0xff] (!%p2883_p8)  ;;  %v2404_v61 = vadd.f32 (!%p2883_p8), %v3861_v34, %v2365_v43 }
 0x16a   : > { %v2402_v50 = vadd.f32 (!%p2883_p8), %v3861_v34, %v2363_v37 }
 0x16c   : > { %v2434_v57 = vmax.f32 (!%p2883_p8), %v2402_v50, 0.0 }
 0x16e   : > { %v2941_v11 = vpack.c.bf16 (!%p2883_p8), %v2434_v57, %v2434_v57 }
 0x170   : > { %2595 = vst.msk [vmem:[%s3446_s27 + $0x54] sm:$0xf] (!%p2883_p8), %vm2573_vm6, %v2941_v11 }
 0x17b   : > { %v3148_v14 = vpop.f32.mrb[12].mxu0 }
 0x17c   : > { %v2078_v17 = vadd.f32 %v3148_v14, %v2074_v3  ;;  %v3166_v8 = vpop.f32.mrb[12].mxu1  ;;  %v2052_v2 = vpop.f32.mrb[13].mxu0  ;;  %2341 = sbr.rel (%p2883_p8) target bundleno = 403 (0x193), region = 40  ;;  %v2390_v3 = vadd.f32 (!%p2883_p8), %v3861_v34, %v2351_v62  ;;  %v2391_v14 = vadd.f32 (!%p2883_p8), %v3861_v34, %v2352_v60  ;;  %v2435_v60 = vmax.f32 (!%p2883_p8), %v2403_v51, 0.0 }
 0x17d   : > { %v2332_v24 = vadd.f32 %v3166_v8, %v2328_v13  ;;  %v2076_v25 = vadd.f32 %v2072_v5, %v2052_v2  ;;  %v2306_v26 = vpop.f32.mrb[13].mxu1  ;;  %v3149_v28 = vpop.f32.mrb[14].mxu0  ;;  %v2357_v13 = vld [vmem:[#allocation2 + $0x78] sm:$0xff] (!%p2883_p8)  ;;  %v2927_v5 = vpack.c.bf16 (!%p2883_p8), %v2420_v6, %v2420_v6  ;;  %v2394_v2 = vadd.f32 (!%p2883_p8), %v3861_v34, %v2355_v7 }
 0x17e   : > { %2082 = vst.msk [vmem:[#allocation2 + $0xd0] sm:$0xff] %vm555_vm5, %v2078_v17  ;;  %v2330_v29 = vadd.f32 %v2326_v15, %v2306_v26  ;;  %v2079_v18 = vadd.f32 %v3149_v28, %v2075_v16  ;;  %v3167_v30 = vpop.f32.mrb[14].mxu1  ;;  %v2055_v19 = vpop.f32.mrb[15].mxu0  ;;  %v2392_v15 = vadd.f32 (!%p2883_p8), %v3861_v34, %v2353_v0  ;;  %v2393_v16 = vadd.f32 (!%p2883_p8), %v3861_v34, %v2354_v56  ;;  %v2358_v28 = vld [vmem:[#allocation2 + $0x80] sm:$0xff] (!%p2883_p8) }
 0x17f   : > { %2336 = vst.msk [vmem:[#allocation2 + $0xf0] sm:$0xff] %vm555_vm5, %v2332_v24  ;;  %2080 = vst.msk [vmem:[#allocation2 + $0xc0] sm:$0xff] %vm555_vm5, %v2076_v25  ;;  %v2333_v20 = vadd.f32 %v3167_v30, %v2329_v21  ;;  %v2077_v22 = vadd.f32 %v2073_v23, %v2055_v19  ;;  %v2309_v31 = vpop.f32.mrb[15].mxu1  ;;  %v2421_v17 = vmax.f32 (!%p2883_p8), %v2389_v12, 0.0  ;;  %v2422_v8 = vmax.f32 (!%p2883_p8), %v2390_v3, 0.0 }
 0x180   : > { %2334 = vst.msk [vmem:[#allocation2 + $0xe0] sm:$0xff] %vm555_vm5, %v2330_v29  ;;  %2083 = vst.msk [vmem:[#allocation2 + $0xd8] sm:$0xff] %vm555_vm5, %v2079_v18  ;;  %v2331_v32 = vadd.f32 %v2327_v27, %v2309_v31  ;;  %v2395_v21 = vadd.f32 (!%p2883_p8), %v3861_v34, %v2356_v9  ;;  %v2423_v23 = vmax.f32 (!%p2883_p8), %v2391_v14, 0.0  ;;  %v2424_v24 = vmax.f32 (!%p2883_p8), %v2392_v15, 0.0  ;;  %v2359_v27 = vld [vmem:[#allocation2 + $0x88] sm:$0xff] (!%p2883_p8)  ;;  %v2362_v31 = vld [vmem:[#allocation2 + $0xa0] sm:$0xff] (!%p2883_p8) }
 0x181   : > { %2337 = vst.msk [vmem:[#allocation2 + $0xf8] sm:$0xff] %vm555_vm5, %v2333_v20  ;;  %2081 = vst.msk [vmem:[#allocation2 + $0xc8] sm:$0xff] %vm555_vm5, %v2077_v22  ;;  %v2425_v25 = vmax.f32 (!%p2883_p8), %v2393_v16, 0.0  ;;  %v2396_v26 = vadd.f32 (!%p2883_p8), %v3861_v34, %v2357_v13  ;;  %v2928_v29 = vpack.c.bf16 (!%p2883_p8), %v2421_v17, %v2421_v17  ;;  %v2929_v18 = vpack.c.bf16 (!%p2883_p8), %v2422_v8, %v2422_v8  ;;  %v2360_v20 = vld [vmem:[#allocation2 + $0x90] sm:$0xff] (!%p2883_p8)  ;;  %v2361_v22 = vld [vmem:[#allocation2 + $0x98] sm:$0xff] (!%p2883_p8) }
 0x182   : > { %2335 = vst.msk [vmem:[#allocation2 + $0xe8] sm:$0xff] %vm555_vm5, %v2331_v32  ;;  %v2426_v30 = vmax.f32 (!%p2883_p8), %v2394_v2, 0.0  ;;  %v2427_v19 = vmax.f32 (!%p2883_p8), %v2395_v21, 0.0  ;;  %v2930_v32 = vpack.c.bf16 (!%p2883_p8), %v2423_v23, %v2423_v23  ;;  %v2931_v33 = vpack.c.bf16 (!%p2883_p8), %v2424_v24, %v2424_v24 }
 0x183   : > { %2581 = vst.msk [vmem:[%s3446_s27 + $0x1c] sm:$0xf] %vm2573_vm6, %v2927_v5  ;;  %v2932_v35 = vpack.c.bf16 %v2425_v25, %v2425_v25  ;;  %v2428_v36 = vmax.f32 %v2396_v26, 0.0  ;;  %2582 = vst.msk [vmem:[%s3446_s27 + $0x20] sm:$0xf] %vm2573_vm6, %v2928_v29  ;;  %v2397_v41 = vadd.f32 %v3861_v34, %v2358_v28  ;;  %v2398_v42 = vadd.f32 %v3861_v34, %v2359_v27 }
 0x184   : > { %2583 = vst.msk [vmem:[%s3446_s27 + $0x24] sm:$0xf] %vm2573_vm6, %v2929_v18  ;;  %v2933_v39 = vpack.c.bf16 %v2426_v30, %v2426_v30  ;;  %v2934_v40 = vpack.c.bf16 %v2427_v19, %v2427_v19  ;;  %2584 = vst.msk [vmem:[%s3446_s27 + $0x28] sm:$0xf] %vm2573_vm6, %v2930_v32  ;;  %v2399_v45 = vadd.f32 %v3861_v34, %v2360_v20  ;;  %v2436_v7 = vmax.f32 %v2404_v61, 0.0 }
 0x185   : > { %2585 = vst.msk [vmem:[%s3446_s27 + $0x2c] sm:$0xf] %vm2573_vm6, %v2931_v33  ;;  %2586 = vst.msk [vmem:[%s3446_s27 + $0x30] sm:$0xf] %vm2573_vm6, %v2932_v35  ;;  %v2935_v44 = vpack.c.bf16 %v2428_v36, %v2428_v36  ;;  %v2400_v46 = vadd.f32 %v3861_v34, %v2361_v22  ;;  %v2401_v47 = vadd.f32 %v3861_v34, %v2362_v31  ;;  %v2429_v48 = vmax.f32 %v2397_v41, 0.0  ;;  %v2368_v0 = vld [vmem:[#allocation2 + $0xd0] sm:$0xff] }
 0x186   : > { %2587 = vst.msk [vmem:[%s3446_s27 + $0x34] sm:$0xf] %vm2573_vm6, %v2933_v39  ;;  %2588 = vst.msk [vmem:[%s3446_s27 + $0x38] sm:$0xf] %vm2573_vm6, %v2934_v40  ;;  %v2430_v49 = vmax.f32 %v2398_v42, 0.0  ;;  %v2431_v52 = vmax.f32 %v2399_v45, 0.0  ;;  %v2942_v12 = vpack.c.bf16 %v2435_v60, %v2435_v60  ;;  %v2943_v14 = vpack.c.bf16 %v2436_v7, %v2436_v7 }
 0x187   : > { %2589 = vst.msk [vmem:[%s3446_s27 + $0x3c] sm:$0xf] %vm2573_vm6, %v2935_v44  ;;  %v2432_v53 = vmax.f32 %v2400_v46, 0.0  ;;  %v2433_v59 = vmax.f32 %v2401_v47, 0.0  ;;  %v2366_v62 = vld [vmem:[#allocation2 + $0xc0] sm:$0xff]  ;;  %v2936_v63 = vpack.c.bf16 %v2429_v48, %v2429_v48  ;;  %v2369_v56 = vld [vmem:[#allocation2 + $0xd8] sm:$0xff]  ;;  %v2407_v15 = vadd.f32 %v3861_v34, %v2368_v0 }
 0x188   : > { %v2367_v54 = vld [vmem:[#allocation2 + $0xc8] sm:$0xff]  ;;  %v2937_v55 = vpack.c.bf16 %v2430_v49, %v2430_v49  ;;  %v2370_v58 = vld [vmem:[#allocation2 + $0xe0] sm:$0xff]  ;;  %v2938_v1 = vpack.c.bf16 %v2431_v52, %v2431_v52  ;;  %v2372_v10 = vld [vmem:[#allocation2 + $0xf0] sm:$0xff]  ;;  %v2405_v3 = vadd.f32 %v3861_v34, %v2366_v62  ;;  %v2408_v16 = vadd.f32 %v3861_v34, %v2369_v56  ;;  %2596 = vst.msk [vmem:[%s3446_s27 + $0x58] sm:$0xf] %vm2573_vm6, %v2942_v12 }
 0x189   : > { %v2939_v4 = vpack.c.bf16 %v2432_v53, %v2432_v53  ;;  %v2940_v6 = vpack.c.bf16 %v2433_v59, %v2433_v59  ;;  %v2371_v9 = vld [vmem:[#allocation2 + $0xe8] sm:$0xff]  ;;  %2590 = vst.msk [vmem:[%s3446_s27 + $0x40] sm:$0xf] %vm2573_vm6, %v2936_v63  ;;  %v2406_v13 = vadd.f32 %v3861_v34, %v2367_v54  ;;  %v2373_v5 = vld [vmem:[#allocation2 + $0xf8] sm:$0xff]  ;;  %v2409_v17 = vadd.f32 %v3861_v34, %v2370_v58 }
 0x18a   : > { %2591 = vst.msk [vmem:[%s3446_s27 + $0x44] sm:$0xf] %vm2573_vm6, %v2937_v55  ;;  %2592 = vst.msk [vmem:[%s3446_s27 + $0x48] sm:$0xf] %vm2573_vm6, %v2938_v1  ;;  %v2437_v8 = vmax.f32 %v2405_v3, 0.0  ;;  %v2410_v21 = vadd.f32 %v3861_v34, %v2371_v9  ;;  %v2411_v23 = vadd.f32 %v3861_v34, %v2372_v10  ;;  %v2439_v24 = vmax.f32 %v2407_v15, 0.0 }
 0x18b   : > { %2593 = vst.msk [vmem:[%s3446_s27 + $0x4c] sm:$0xf] %vm2573_vm6, %v2939_v4  ;;  %2594 = vst.msk [vmem:[%s3446_s27 + $0x50] sm:$0xf] %vm2573_vm6, %v2940_v6  ;;  %v2438_v2 = vmax.f32 %v2406_v13, 0.0  ;;  %v2440_v25 = vmax.f32 %v2408_v16, 0.0  ;;  %v2412_v28 = vadd.f32 %v3861_v34, %v2373_v5 }
 0x18c   : > { %2597 = vst.msk [vmem:[%s3446_s27 + $0x5c] sm:$0xf] %vm2573_vm6, %v2943_v14  ;;  %v2441_v26 = vmax.f32 %v2409_v17, 0.0  ;;  %v2944_v27 = vpack.c.bf16 %v2437_v8, %v2437_v8  ;;  %v2442_v18 = vmax.f32 %v2410_v21, 0.0  ;;  %v2443_v30 = vmax.f32 %v2411_v23, 0.0 }
 0x18d   : > { %v2945_v29 = vpack.c.bf16 %v2438_v2, %v2438_v2  ;;  %v2946_v19 = vpack.c.bf16 %v2439_v24, %v2439_v24  ;;  %v2947_v20 = vpack.c.bf16 %v2440_v25, %v2440_v25  ;;  %v2444_v31 = vmax.f32 %v2412_v28, 0.0 }
 0x18e   : > { %v2948_v22 = vpack.c.bf16 %v2441_v26, %v2441_v26  ;;  %2598 = vst.msk [vmem:[%s3446_s27 + $0x60] sm:$0xf] %vm2573_vm6, %v2944_v27  ;;  %v2949_v32 = vpack.c.bf16 %v2442_v18, %v2442_v18  ;;  %v2950_v33 = vpack.c.bf16 %v2443_v30, %v2443_v30 }
 0x18f   : > { %2599 = vst.msk [vmem:[%s3446_s27 + $0x64] sm:$0xf] %vm2573_vm6, %v2945_v29  ;;  %2600 = vst.msk [vmem:[%s3446_s27 + $0x68] sm:$0xf] %vm2573_vm6, %v2946_v19  ;;  %v2951_v34 = vpack.c.bf16 %v2444_v31, %v2444_v31 }
 0x190   : > { %2601 = vst.msk [vmem:[%s3446_s27 + $0x6c] sm:$0xf] %vm2573_vm6, %v2947_v20  ;;  %2602 = vst.msk [vmem:[%s3446_s27 + $0x70] sm:$0xf] %vm2573_vm6, %v2948_v22 }
 0x191   : > { %2603 = vst.msk [vmem:[%s3446_s27 + $0x74] sm:$0xf] %vm2573_vm6, %v2949_v32  ;;  %2604 = vst.msk [vmem:[%s3446_s27 + $0x78] sm:$0xf] %vm2573_vm6, %v2950_v33 }
 0x192   : > { %2605 = vst.msk [vmem:[%s3446_s27 + $0x7c] sm:$0xf] %vm2573_vm6, %v2951_v34 }
 0x193 PF: > { %s13_s16 = sadd.s32 1, %s3386_s16   ;;  %s3978_s12 = smov %s3378_s14 }
 0x194   : > { %p10_p9 = scmp.ge.s32.totalorder %s13_s16, 14   ;;  %s3979_s13 = smov %s3382_s15 }
 0x195   : > { %s3980_s14 = smov %s3983_s17  ;;  %s3981_s15 = smov %s3987_s18 }
 0x196   :  { %12 = sbr.rel (!%p10_p9) target bundleno = 3 (0x3), region = 90 }

</bundles_post_ra>
